<compile_context>
chip_gen: v5e
topology: v5e:2x2
jax: 0.10.0
libtpu: 0.0.40
codegen_flags: <defaults>
</compile_context>

<pallas_src>
import functools

import jax
import jax.numpy as jnp
from jax import lax
from jax.experimental import pallas as pl
from jax.experimental.pallas import tpu as pltpu

NEG_INF_FILL = -1e9  # matches torch masked_fill(float('-1e9'))


def mha_kernel(x_ref, prow_ref, pcol_ref, wqkv_ref, bqkv_ref, w0_ref, b0_ref,
               out_ref, qkv_ref, ho_ref, *, num_heads, seq_len, batch_tile):
    Bt, S, H = batch_tile, seq_len, num_heads
    D = w0_ref.shape[0]
    d_h = D // H

    # ---- fused Q/K/V projection: one MXU op, M = Bt*S rows, N = 3D --------------------
    qkv = jnp.dot(x_ref[...], wqkv_ref[...], preferred_element_type=jnp.float32)
    qkv_ref[...] = (qkv + bqkv_ref[...]).astype(jnp.bfloat16)   # bf16 slab; f32 not kept live

    # ---- combined padding + causal mask, built once per grid step ----------------------
    q_ok = pcol_ref[...] > 0                                    # (Bt, S, 1) query pos valid
    k_ok = prow_ref[...] > 0                                    # (Bt, 1, S) key pos valid
    ri = lax.broadcasted_iota(jnp.int32, (S, S), 0)             # batch-independent (S, S)
    ci = lax.broadcasted_iota(jnp.int32, (S, S), 1)
    causal = (ci <= ri)[None, :, :]                             # (1, S, S)
    valid = jnp.logical_and(jnp.logical_and(q_ok, k_ok), causal)  # (Bt, S, S)

    # ---- heads: batched dot_generals; head outputs written into the bf16 slab ----------
    # Static per-head slices on VMEM refs keep only the current head's temporaries live.
    for h in range(H):
        lo = h * d_h
        qh = qkv_ref[:, lo:lo + d_h].reshape(Bt, S, d_h)            # scale folded into W_Q
        kh = qkv_ref[:, D + lo:D + lo + d_h].reshape(Bt, S, d_h)
        vh = qkv_ref[:, 2 * D + lo:2 * D + lo + d_h].reshape(Bt, S, d_h)

        # scores: 'bqd,bkd->bqk', batched over the Bt batch elements of the tile
        s = lax.dot_general(qh, kh, (((2,), (2,)), ((0,), (0,))),
                            preferred_element_type=jnp.float32)
        s = jnp.where(valid, s, NEG_INF_FILL)
        s = s - jnp.max(s, axis=-1, keepdims=True)
        e = jnp.exp(s)
        w = e * pl.reciprocal(jnp.sum(e, axis=-1, keepdims=True), approx=True)

        # weights @ V: 'bqk,bkd->bqd'
        ho = lax.dot_general(w.astype(jnp.bfloat16), vh,
                             (((2,), (1,)), ((0,), (0,))),
                             preferred_element_type=jnp.float32)    # (Bt, S, d_h)
        ho_ref[:, lo:lo + d_h] = ho.reshape(Bt * S, d_h).astype(jnp.bfloat16)

    # ---- single K=D output projection over the head-output slab (MXU-filled) -----------
    out_ref[...] = (jnp.dot(ho_ref[...], w0_ref[...],
                            preferred_element_type=jnp.float32) + b0_ref[...])


def _pick_batch_tile(batch, seq_len, target_rows=256):
    """Pick Bt | batch with (Bt*seq_len) % 8 == 0 (or Bt == batch).

    Prefers a choice that leaves >= 2 grid steps (v7x 2-TC sharding), and among those the
    smallest Bt reaching Bt*seq_len >= target_rows (MXU M-fill); otherwise the largest."""
    divs = [bt for bt in range(1, batch + 1)
            if batch % bt == 0 and ((bt * seq_len) % 8 == 0 or bt == batch)]
    multi = [bt for bt in divs if batch // bt >= 2]
    cands = multi if multi else divs
    for bt in cands:
        if bt * seq_len >= target_rows:
            return bt
    return cands[-1]


def mha_forward(X, padding_mask, params, num_heads):
    """Pallas-fused equivalent of torch MHA.forward(X, padding_mask) with masked=True."""
    B, S, D = X.shape
    assert D % num_heads == 0, "d must be divisible by total number of heads"
    d_h = D // num_heads
    scale = 1.0 / (d_h ** 0.5)
    Bt = _pick_batch_tile(B, S)
    grid = (B // Bt,)

    # bf16 activations: halves activation HBM->VMEM DMA and the x double-buffer VMEM.
    x2d = X.reshape(B * S, D).astype(jnp.bfloat16)
    pad_i = padding_mask.astype(jnp.int32)
    prow = pad_i.reshape(B, 1, S)                      # key-position validity
    pcol = pad_i.reshape(B, S, 1)                      # query-position validity

    # Fused QKV weight/bias, 1/sqrt(d_h) folded into the Q columns (zero in-kernel cost).
    wqkv = jnp.concatenate([params["wq"] * scale, params["wk"], params["wv"]],
                           axis=1).astype(jnp.bfloat16)            # (D, 3D)
    bqkv = jnp.concatenate([params["bq"] * scale, params["bk"], params["bv"]],
                           axis=1).astype(jnp.float32)             # (1, 3D)
    w0 = params["w0"].astype(jnp.bfloat16)
    b0 = params["b0"].astype(jnp.float32)

    def tile_rows(i):          # activation/output tiles walk the batch-tile grid axis
        return (i, 0)

    def whole(i):              # weights / biases: constant block index -> fetched once
        return (0, 0)

    cost = pl.CostEstimate(
        flops=8 * B * S * D * D + 4 * B * S * S * D,               # QKV + attn + W0 matmuls
        transcendentals=B * num_heads * S * S,                     # softmax exp
        bytes_accessed=(B * S * D * 2 + B * S * D * 4              # x (bf16) + out (f32)
                        + D * 3 * D * 2 + 3 * D * 4                # W_QKV + b_QKV
                        + D * D * 2 + D * 4 + 2 * B * S * 4),      # W_0 + b_0 + masks
    )

    kernel = functools.partial(mha_kernel, num_heads=num_heads,
                               seq_len=S, batch_tile=Bt)

    def run(weight_pipeline_mode):
        wkw = ({} if weight_pipeline_mode is None
               else dict(pipeline_mode=weight_pipeline_mode))
        in_specs = [
            pl.BlockSpec((Bt * S, D), tile_rows),                      # x (bf16 slab)
            pl.BlockSpec((Bt, 1, S), lambda i: (i, 0, 0)),             # padding mask (row)
            pl.BlockSpec((Bt, S, 1), lambda i: (i, 0, 0)),             # padding mask (col)
            pl.BlockSpec((D, 3 * D), whole, **wkw),                    # fused W_QKV
            pl.BlockSpec((1, 3 * D), whole, **wkw),                    # fused b_QKV
            pl.BlockSpec((D, D), whole, **wkw),                        # W_0
            pl.BlockSpec((1, D), whole, **wkw),                        # b_0
        ]
        return pl.pallas_call(
            kernel,
            out_shape=jax.ShapeDtypeStruct((B * S, D), jnp.float32),
            grid=grid,
            in_specs=in_specs,
            out_specs=pl.BlockSpec((Bt * S, D), tile_rows),
            scratch_shapes=[
                pltpu.VMEM((Bt * S, 3 * D), jnp.bfloat16),             # QKV slab
                pltpu.VMEM((Bt * S, D), jnp.bfloat16),                 # head-output slab
            ],
            compiler_params=pltpu.CompilerParams(
                dimension_semantics=("parallel",),       # batch tiles shard across TCs
                vmem_limit_bytes=64 * 1024 * 1024),      # safe on v5e/v6e/v7x
            cost_estimate=cost,
        )(x2d, prow, pcol, wqkv, bqkv, w0, b0)

    try:
        # Grid-invariant weights: request single-buffering to halve their VMEM footprint
        # (matters on v7x's 64 MiB VMEM at production D).
        out2d = run(pl.Buffered(1))
    except Exception:
        # pipeline_mode / Buffered(1) not supported on this jax version -> default buffers.
        out2d = run(None)
    return out2d.reshape(B, S, D)


# ----------------------------- reference / setup ------------------------------

def init_mha_params(key, d, total_heads):
    assert d % total_heads == 0
    ks = jax.random.split(key, 8)

    def lin(kw, kb, d_in, d_out):
        bound = 1.0 / (d_in ** 0.5)          # torch Linear init range, math layout (in, out)
        w = jax.random.uniform(kw, (d_in, d_out), jnp.float32, -bound, bound)
        b = jax.random.uniform(kb, (1, d_out), jnp.float32, -bound, bound)
        return w, b

    wq, bq = lin(ks[0], ks[1], d, d)         # per-head W_Q concatenated column-wise
    wk, bk = lin(ks[2], ks[3], d, d)
    wv, bv = lin(ks[4], ks[5], d, d)
    w0, b0 = lin(ks[6], ks[7], d, d)
    return dict(wq=wq, bq=bq, wk=wk, bk=bk, wv=wv, bv=bv, w0=w0, b0=b0)


def mha_reference(X, padding_mask, params, num_heads):
    """Pure-JAX f32 reference mirroring the torch MHA/SHA forward."""
    B, S, D = X.shape
    d_h = D // num_heads
    q = X @ params["wq"] + params["bq"]
    k = X @ params["wk"] + params["bk"]
    v = X @ params["wv"] + params["bv"]
    pad = padding_mask.astype(bool)
    causal = jnp.tril(jnp.ones((S, S), dtype=bool))
    valid = pad[:, :, None] & pad[:, None, :] & causal[None]
    outs = []
    for h in range(num_heads):
        sl = slice(h * d_h, (h + 1) * d_h)
        s = jnp.einsum('bsd,btd->bst', q[..., sl], k[..., sl]) / (d_h ** 0.5)
        s = jnp.where(valid, s, NEG_INF_FILL)
        w = jax.nn.softmax(s, axis=-1)
        outs.append(jnp.einsum('bst,btd->bsd', w, v[..., sl]))
    attn = jnp.concatenate(outs, axis=-1)
    return attn @ params["w0"] + params["b0"]


if __name__ == "__main__":
    B, S, D, H = 2, 8, 32, 4
    key = jax.random.PRNGKey(0)
    k_x, k_p = jax.random.split(key)

    X = jax.random.normal(k_x, (B, S, D), jnp.float32) * 0.5
    params = init_mha_params(k_p, D, H)
    # 1 = real token, 0 = pad; second sequence has two trailing pad positions
    padding_mask = jnp.array([[1, 1, 1, 1, 1, 1, 1, 1],
                              [1, 1, 1, 1, 1, 1, 0, 0]], dtype=jnp.int32)

    out = mha_forward(X, padding_mask, params, H)
    jax.block_until_ready(out)
    assert out.shape == (B, S, D)

    ref = mha_reference(X, padding_mask, params, H)
    max_err = float(jnp.max(jnp.abs(out - ref)))
    assert max_err < 5e-2, f"kernel mismatch vs reference: max abs err {max_err}"
    print("KERNEL_OK")
</pallas_src>

<mosaic_0001>
module attributes {stable_mosaic.version = 11 : i64} {
  func.func @mha_kernel(%arg0: i32, %arg1: memref<8x32xbf16, #tpu.memory_space<vmem>>, %arg2: memref<1x1x8xi32, #tpu.memory_space<vmem>>, %arg3: memref<1x8x1xi32, #tpu.memory_space<vmem>>, %arg4: memref<32x96xbf16, #tpu.memory_space<vmem>>, %arg5: memref<1x96xf32, #tpu.memory_space<vmem>>, %arg6: memref<32x32xbf16, #tpu.memory_space<vmem>>, %arg7: memref<1x32xf32, #tpu.memory_space<vmem>>, %arg8: memref<8x32xf32, #tpu.memory_space<vmem>>, %arg9: memref<8x96xbf16, #tpu.memory_space<vmem>>, %arg10: memref<8x32xbf16, #tpu.memory_space<vmem>>) attributes {dimension_semantics = [#tpu.dimension_semantics<parallel>], iteration_bounds = array<i64: 2>, scalar_prefetch = 0 : i64, scratch_operands = 2 : i64, tpu.core_type = #tpu.core_type<tc>, window_params = [{transform_indices = @transform_0, window_bounds = array<i64: 8, 32>}, {transform_indices = @transform_1, window_bounds = array<i64: 1, 1, 8>}, {transform_indices = @transform_2, window_bounds = array<i64: 1, 8, 1>}, {pipeline_mode = #tpu.pipeline_mode<synchronous>, transform_indices = @transform_3, window_bounds = array<i64: 32, 96>}, {pipeline_mode = #tpu.pipeline_mode<synchronous>, transform_indices = @transform_4, window_bounds = array<i64: 1, 96>}, {pipeline_mode = #tpu.pipeline_mode<synchronous>, transform_indices = @transform_5, window_bounds = array<i64: 32, 32>}, {pipeline_mode = #tpu.pipeline_mode<synchronous>, transform_indices = @transform_6, window_bounds = array<i64: 1, 32>}, {transform_indices = @transform_7, window_bounds = array<i64: 8, 32>}]} {
    %c0 = arith.constant 0 : index
    %c0_0 = arith.constant 0 : index
    %0 = vector.load %arg1[%c0, %c0_0] : memref<8x32xbf16, #tpu.memory_space<vmem>>, vector<8x32xbf16>
    %c0_1 = arith.constant 0 : index
    %c0_2 = arith.constant 0 : index
    %1 = vector.load %arg4[%c0_1, %c0_2] : memref<32x96xbf16, #tpu.memory_space<vmem>>, vector<32x96xbf16>
    %cst = arith.constant dense<0.000000e+00> : vector<8x96xf32>
    %2 = tpu.matmul %0, %1, %cst {dimension_numbers = #tpu.dot_dimension_numbers<[1], [0], [0], [1], [0, 0, 1, 1], [], []>} : vector<8x32xbf16>, vector<32x96xbf16>, vector<8x96xf32> -> vector<8x96xf32>
    %c0_3 = arith.constant 0 : index
    %c0_4 = arith.constant 0 : index
    %3 = vector.load %arg5[%c0_3, %c0_4] : memref<1x96xf32, #tpu.memory_space<vmem>>, vector<1x96xf32>
    %4 = vector.broadcast %3 : vector<1x96xf32> to vector<8x96xf32>
    %5 = arith.addf %2, %4 : vector<8x96xf32>
    %6 = arith.truncf %5 : vector<8x96xf32> to vector<8x96xbf16>
    %c0_5 = arith.constant 0 : index
    %c0_6 = arith.constant 0 : index
    %7 = vector.load %arg9[%c0_5, %c0_6] : memref<8x96xbf16, #tpu.memory_space<vmem>>, vector<8x96xbf16>
    tpu.vector_store %arg9[%c0_5, %c0_6], %6 {strides = array<i32>} : memref<8x96xbf16, #tpu.memory_space<vmem>>, vector<8x96xbf16>,
    %c0_7 = arith.constant 0 : index
    %c0_8 = arith.constant 0 : index
    %c0_9 = arith.constant 0 : index
    %8 = vector.load %arg3[%c0_7, %c0_8, %c0_9] : memref<1x8x1xi32, #tpu.memory_space<vmem>>, vector<1x8x1xi32>
    %c0_i32 = arith.constant 0 : i32
    %9 = vector.broadcast %c0_i32 : i32 to vector<1x8x1xi32>
    %10 = arith.cmpi sgt, %8, %9 : vector<1x8x1xi32>
    %c0_10 = arith.constant 0 : index
    %c0_11 = arith.constant 0 : index
    %c0_12 = arith.constant 0 : index
    %11 = vector.load %arg2[%c0_10, %c0_11, %c0_12] : memref<1x1x8xi32, #tpu.memory_space<vmem>>, vector<1x1x8xi32>
    %c0_i32_13 = arith.constant 0 : i32
    %12 = vector.broadcast %c0_i32_13 : i32 to vector<1x1x8xi32>
    %13 = arith.cmpi sgt, %11, %12 : vector<1x1x8xi32>
    %14 = tpu.iota {dimensions = array<i32: 0>} : vector<8x8xi32>
    %15 = tpu.iota {dimensions = array<i32: 1>} : vector<8x8xi32>
    %16 = arith.cmpi sle, %15, %14 : vector<8x8xi32>
    %17 = vector.shape_cast %16 : vector<8x8xi1> to vector<1x8x8xi1>
    %18 = vector.broadcast %10 : vector<1x8x1xi1> to vector<1x8x8xi1>
    %19 = vector.broadcast %13 : vector<1x1x8xi1> to vector<1x8x8xi1>
    %20 = arith.andi %18, %19 : vector<1x8x8xi1>
    %21 = arith.andi %20, %17 : vector<1x8x8xi1>
    %c0_14 = arith.constant 0 : index
    %c0_15 = arith.constant 0 : index
    %22 = vector.load %arg9[%c0_14, %c0_15] : memref<8x96xbf16, #tpu.memory_space<vmem>>, vector<8x8xbf16>
    %23 = vector.shape_cast %22 : vector<8x8xbf16> to vector<1x8x8xbf16>
    %c0_16 = arith.constant 0 : index
    %c32 = arith.constant 32 : index
    %24 = vector.load %arg9[%c0_16, %c32] : memref<8x96xbf16, #tpu.memory_space<vmem>>, vector<8x8xbf16>
    %25 = vector.shape_cast %24 : vector<8x8xbf16> to vector<1x8x8xbf16>
    %c0_17 = arith.constant 0 : index
    %c64 = arith.constant 64 : index
    %26 = vector.load %arg9[%c0_17, %c64] : memref<8x96xbf16, #tpu.memory_space<vmem>>, vector<8x8xbf16>
    %27 = vector.shape_cast %26 : vector<8x8xbf16> to vector<1x8x8xbf16>
    %cst_18 = arith.constant dense<0.000000e+00> : vector<1x8x8xf32>
    %28 = tpu.matmul %23, %25, %cst_18 {dimension_numbers = #tpu.dot_dimension_numbers<[2], [2], [1], [1], [0, 0, 0, 1, 1, 1], [0], [0]>} : vector<1x8x8xbf16>, vector<1x8x8xbf16>, vector<1x8x8xf32> -> vector<1x8x8xf32>
    %cst_19 = arith.constant -1.000000e+09 : f32
    %29 = vector.broadcast %cst_19 : f32 to vector<1x8x8xf32>
    %30 = arith.select %21, %28, %29 : vector<1x8x8xi1>, vector<1x8x8xf32>
    %cst_20 = arith.constant dense<0xFF800000> : vector<1x8xf32>
    %31 = vector.multi_reduction <maximumf>, %30, %cst_20 [2] : vector<1x8x8xf32> to vector<1x8xf32>
    %32 = vector.shape_cast %31 : vector<1x8xf32> to vector<1x8x1xf32>
    %33 = vector.broadcast %32 : vector<1x8x1xf32> to vector<1x8x8xf32>
    %34 = arith.subf %30, %33 : vector<1x8x8xf32>
    %35 = math.exp %34 : vector<1x8x8xf32>
    %cst_21 = arith.constant dense<0.000000e+00> : vector<1x8xf32>
    %36 = vector.multi_reduction <add>, %35, %cst_21 [2] : vector<1x8x8xf32> to vector<1x8xf32>
    %37 = vector.shape_cast %36 : vector<1x8xf32> to vector<1x8x1xf32>
    %38 = tpu.reciprocal %37 {approx = true} : vector<1x8x1xf32> -> vector<1x8x1xf32>
    %39 = vector.broadcast %38 : vector<1x8x1xf32> to vector<1x8x8xf32>
    %40 = arith.mulf %35, %39 : vector<1x8x8xf32>
    %41 = arith.truncf %40 : vector<1x8x8xf32> to vector<1x8x8xbf16>
    %cst_22 = arith.constant dense<0.000000e+00> : vector<1x8x8xf32>
    %42 = tpu.matmul %41, %27, %cst_22 {dimension_numbers = #tpu.dot_dimension_numbers<[2], [1], [1], [2], [0, 0, 0, 1, 1, 2], [0], [0]>} : vector<1x8x8xbf16>, vector<1x8x8xbf16>, vector<1x8x8xf32> -> vector<1x8x8xf32>
    %43 = vector.shape_cast %42 : vector<1x8x8xf32> to vector<8x8xf32>
    %44 = arith.truncf %43 : vector<8x8xf32> to vector<8x8xbf16>
    %c0_23 = arith.constant 0 : index
    %c0_24 = arith.constant 0 : index
    %45 = vector.load %arg10[%c0_23, %c0_24] : memref<8x32xbf16, #tpu.memory_space<vmem>>, vector<8x8xbf16>
    tpu.vector_store %arg10[%c0_23, %c0_24], %44 {strides = array<i32>} : memref<8x32xbf16, #tpu.memory_space<vmem>>, vector<8x8xbf16>,
    %c0_25 = arith.constant 0 : index
    %c8 = arith.constant 8 : index
    %46 = vector.load %arg9[%c0_25, %c8] : memref<8x96xbf16, #tpu.memory_space<vmem>>, vector<8x8xbf16>
    %47 = vector.shape_cast %46 : vector<8x8xbf16> to vector<1x8x8xbf16>
    %c0_26 = arith.constant 0 : index
    %c40 = arith.constant 40 : index
    %48 = vector.load %arg9[%c0_26, %c40] : memref<8x96xbf16, #tpu.memory_space<vmem>>, vector<8x8xbf16>
    %49 = vector.shape_cast %48 : vector<8x8xbf16> to vector<1x8x8xbf16>
    %c0_27 = arith.constant 0 : index
    %c72 = arith.constant 72 : index
    %50 = vector.load %arg9[%c0_27, %c72] : memref<8x96xbf16, #tpu.memory_space<vmem>>, vector<8x8xbf16>
    %51 = vector.shape_cast %50 : vector<8x8xbf16> to vector<1x8x8xbf16>
    %cst_28 = arith.constant dense<0.000000e+00> : vector<1x8x8xf32>
    %52 = tpu.matmul %47, %49, %cst_28 {dimension_numbers = #tpu.dot_dimension_numbers<[2], [2], [1], [1], [0, 0, 0, 1, 1, 1], [0], [0]>} : vector<1x8x8xbf16>, vector<1x8x8xbf16>, vector<1x8x8xf32> -> vector<1x8x8xf32>
    %cst_29 = arith.constant -1.000000e+09 : f32
    %53 = vector.broadcast %cst_29 : f32 to vector<1x8x8xf32>
    %54 = arith.select %21, %52, %53 : vector<1x8x8xi1>, vector<1x8x8xf32>
    %cst_30 = arith.constant dense<0xFF800000> : vector<1x8xf32>
    %55 = vector.multi_reduction <maximumf>, %54, %cst_30 [2] : vector<1x8x8xf32> to vector<1x8xf32>
    %56 = vector.shape_cast %55 : vector<1x8xf32> to vector<1x8x1xf32>
    %57 = vector.broadcast %56 : vector<1x8x1xf32> to vector<1x8x8xf32>
    %58 = arith.subf %54, %57 : vector<1x8x8xf32>
    %59 = math.exp %58 : vector<1x8x8xf32>
    %cst_31 = arith.constant dense<0.000000e+00> : vector<1x8xf32>
    %60 = vector.multi_reduction <add>, %59, %cst_31 [2] : vector<1x8x8xf32> to vector<1x8xf32>
    %61 = vector.shape_cast %60 : vector<1x8xf32> to vector<1x8x1xf32>
    %62 = tpu.reciprocal %61 {approx = true} : vector<1x8x1xf32> -> vector<1x8x1xf32>
    %63 = vector.broadcast %62 : vector<1x8x1xf32> to vector<1x8x8xf32>
    %64 = arith.mulf %59, %63 : vector<1x8x8xf32>
    %65 = arith.truncf %64 : vector<1x8x8xf32> to vector<1x8x8xbf16>
    %cst_32 = arith.constant dense<0.000000e+00> : vector<1x8x8xf32>
    %66 = tpu.matmul %65, %51, %cst_32 {dimension_numbers = #tpu.dot_dimension_numbers<[2], [1], [1], [2], [0, 0, 0, 1, 1, 2], [0], [0]>} : vector<1x8x8xbf16>, vector<1x8x8xbf16>, vector<1x8x8xf32> -> vector<1x8x8xf32>
    %67 = vector.shape_cast %66 : vector<1x8x8xf32> to vector<8x8xf32>
    %68 = arith.truncf %67 : vector<8x8xf32> to vector<8x8xbf16>
    %c0_33 = arith.constant 0 : index
    %c8_34 = arith.constant 8 : index
    %69 = vector.load %arg10[%c0_33, %c8_34] : memref<8x32xbf16, #tpu.memory_space<vmem>>, vector<8x8xbf16>
    tpu.vector_store %arg10[%c0_33, %c8_34], %68 {strides = array<i32>} : memref<8x32xbf16, #tpu.memory_space<vmem>>, vector<8x8xbf16>,
    %c0_35 = arith.constant 0 : index
    %c16 = arith.constant 16 : index
    %70 = vector.load %arg9[%c0_35, %c16] : memref<8x96xbf16, #tpu.memory_space<vmem>>, vector<8x8xbf16>
    %71 = vector.shape_cast %70 : vector<8x8xbf16> to vector<1x8x8xbf16>
    %c0_36 = arith.constant 0 : index
    %c48 = arith.constant 48 : index
    %72 = vector.load %arg9[%c0_36, %c48] : memref<8x96xbf16, #tpu.memory_space<vmem>>, vector<8x8xbf16>
    %73 = vector.shape_cast %72 : vector<8x8xbf16> to vector<1x8x8xbf16>
    %c0_37 = arith.constant 0 : index
    %c80 = arith.constant 80 : index
    %74 = vector.load %arg9[%c0_37, %c80] : memref<8x96xbf16, #tpu.memory_space<vmem>>, vector<8x8xbf16>
    %75 = vector.shape_cast %74 : vector<8x8xbf16> to vector<1x8x8xbf16>
    %cst_38 = arith.constant dense<0.000000e+00> : vector<1x8x8xf32>
    %76 = tpu.matmul %71, %73, %cst_38 {dimension_numbers = #tpu.dot_dimension_numbers<[2], [2], [1], [1], [0, 0, 0, 1, 1, 1], [0], [0]>} : vector<1x8x8xbf16>, vector<1x8x8xbf16>, vector<1x8x8xf32> -> vector<1x8x8xf32>
    %cst_39 = arith.constant -1.000000e+09 : f32
    %77 = vector.broadcast %cst_39 : f32 to vector<1x8x8xf32>
    %78 = arith.select %21, %76, %77 : vector<1x8x8xi1>, vector<1x8x8xf32>
    %cst_40 = arith.constant dense<0xFF800000> : vector<1x8xf32>
    %79 = vector.multi_reduction <maximumf>, %78, %cst_40 [2] : vector<1x8x8xf32> to vector<1x8xf32>
    %80 = vector.shape_cast %79 : vector<1x8xf32> to vector<1x8x1xf32>
    %81 = vector.broadcast %80 : vector<1x8x1xf32> to vector<1x8x8xf32>
    %82 = arith.subf %78, %81 : vector<1x8x8xf32>
    %83 = math.exp %82 : vector<1x8x8xf32>
    %cst_41 = arith.constant dense<0.000000e+00> : vector<1x8xf32>
    %84 = vector.multi_reduction <add>, %83, %cst_41 [2] : vector<1x8x8xf32> to vector<1x8xf32>
    %85 = vector.shape_cast %84 : vector<1x8xf32> to vector<1x8x1xf32>
    %86 = tpu.reciprocal %85 {approx = true} : vector<1x8x1xf32> -> vector<1x8x1xf32>
    %87 = vector.broadcast %86 : vector<1x8x1xf32> to vector<1x8x8xf32>
    %88 = arith.mulf %83, %87 : vector<1x8x8xf32>
    %89 = arith.truncf %88 : vector<1x8x8xf32> to vector<1x8x8xbf16>
    %cst_42 = arith.constant dense<0.000000e+00> : vector<1x8x8xf32>
    %90 = tpu.matmul %89, %75, %cst_42 {dimension_numbers = #tpu.dot_dimension_numbers<[2], [1], [1], [2], [0, 0, 0, 1, 1, 2], [0], [0]>} : vector<1x8x8xbf16>, vector<1x8x8xbf16>, vector<1x8x8xf32> -> vector<1x8x8xf32>
    %91 = vector.shape_cast %90 : vector<1x8x8xf32> to vector<8x8xf32>
    %92 = arith.truncf %91 : vector<8x8xf32> to vector<8x8xbf16>
    %c0_43 = arith.constant 0 : index
    %c16_44 = arith.constant 16 : index
    %93 = vector.load %arg10[%c0_43, %c16_44] : memref<8x32xbf16, #tpu.memory_space<vmem>>, vector<8x8xbf16>
    tpu.vector_store %arg10[%c0_43, %c16_44], %92 {strides = array<i32>} : memref<8x32xbf16, #tpu.memory_space<vmem>>, vector<8x8xbf16>,
    %c0_45 = arith.constant 0 : index
    %c24 = arith.constant 24 : index
    %94 = vector.load %arg9[%c0_45, %c24] : memref<8x96xbf16, #tpu.memory_space<vmem>>, vector<8x8xbf16>
    %95 = vector.shape_cast %94 : vector<8x8xbf16> to vector<1x8x8xbf16>
    %c0_46 = arith.constant 0 : index
    %c56 = arith.constant 56 : index
    %96 = vector.load %arg9[%c0_46, %c56] : memref<8x96xbf16, #tpu.memory_space<vmem>>, vector<8x8xbf16>
    %97 = vector.shape_cast %96 : vector<8x8xbf16> to vector<1x8x8xbf16>
    %c0_47 = arith.constant 0 : index
    %c88 = arith.constant 88 : index
    %98 = vector.load %arg9[%c0_47, %c88] : memref<8x96xbf16, #tpu.memory_space<vmem>>, vector<8x8xbf16>
    %99 = vector.shape_cast %98 : vector<8x8xbf16> to vector<1x8x8xbf16>
    %cst_48 = arith.constant dense<0.000000e+00> : vector<1x8x8xf32>
    %100 = tpu.matmul %95, %97, %cst_48 {dimension_numbers = #tpu.dot_dimension_numbers<[2], [2], [1], [1], [0, 0, 0, 1, 1, 1], [0], [0]>} : vector<1x8x8xbf16>, vector<1x8x8xbf16>, vector<1x8x8xf32> -> vector<1x8x8xf32>
    %cst_49 = arith.constant -1.000000e+09 : f32
    %101 = vector.broadcast %cst_49 : f32 to vector<1x8x8xf32>
    %102 = arith.select %21, %100, %101 : vector<1x8x8xi1>, vector<1x8x8xf32>
    %cst_50 = arith.constant dense<0xFF800000> : vector<1x8xf32>
    %103 = vector.multi_reduction <maximumf>, %102, %cst_50 [2] : vector<1x8x8xf32> to vector<1x8xf32>
    %104 = vector.shape_cast %103 : vector<1x8xf32> to vector<1x8x1xf32>
    %105 = vector.broadcast %104 : vector<1x8x1xf32> to vector<1x8x8xf32>
    %106 = arith.subf %102, %105 : vector<1x8x8xf32>
    %107 = math.exp %106 : vector<1x8x8xf32>
    %cst_51 = arith.constant dense<0.000000e+00> : vector<1x8xf32>
    %108 = vector.multi_reduction <add>, %107, %cst_51 [2] : vector<1x8x8xf32> to vector<1x8xf32>
    %109 = vector.shape_cast %108 : vector<1x8xf32> to vector<1x8x1xf32>
    %110 = tpu.reciprocal %109 {approx = true} : vector<1x8x1xf32> -> vector<1x8x1xf32>
    %111 = vector.broadcast %110 : vector<1x8x1xf32> to vector<1x8x8xf32>
    %112 = arith.mulf %107, %111 : vector<1x8x8xf32>
    %113 = arith.truncf %112 : vector<1x8x8xf32> to vector<1x8x8xbf16>
    %cst_52 = arith.constant dense<0.000000e+00> : vector<1x8x8xf32>
    %114 = tpu.matmul %113, %99, %cst_52 {dimension_numbers = #tpu.dot_dimension_numbers<[2], [1], [1], [2], [0, 0, 0, 1, 1, 2], [0], [0]>} : vector<1x8x8xbf16>, vector<1x8x8xbf16>, vector<1x8x8xf32> -> vector<1x8x8xf32>
    %115 = vector.shape_cast %114 : vector<1x8x8xf32> to vector<8x8xf32>
    %116 = arith.truncf %115 : vector<8x8xf32> to vector<8x8xbf16>
    %c0_53 = arith.constant 0 : index
    %c24_54 = arith.constant 24 : index
    %117 = vector.load %arg10[%c0_53, %c24_54] : memref<8x32xbf16, #tpu.memory_space<vmem>>, vector<8x8xbf16>
    tpu.vector_store %arg10[%c0_53, %c24_54], %116 {strides = array<i32>} : memref<8x32xbf16, #tpu.memory_space<vmem>>, vector<8x8xbf16>,
    %c0_55 = arith.constant 0 : index
    %c0_56 = arith.constant 0 : index
    %118 = vector.load %arg10[%c0_55, %c0_56] : memref<8x32xbf16, #tpu.memory_space<vmem>>, vector<8x32xbf16>
    %c0_57 = arith.constant 0 : index
    %c0_58 = arith.constant 0 : index
    %119 = vector.load %arg6[%c0_57, %c0_58] : memref<32x32xbf16, #tpu.memory_space<vmem>>, vector<32x32xbf16>
    %cst_59 = arith.constant dense<0.000000e+00> : vector<8x32xf32>
    %120 = tpu.matmul %118, %119, %cst_59 {dimension_numbers = #tpu.dot_dimension_numbers<[1], [0], [0], [1], [0, 0, 1, 1], [], []>} : vector<8x32xbf16>, vector<32x32xbf16>, vector<8x32xf32> -> vector<8x32xf32>
    %c0_60 = arith.constant 0 : index
    %c0_61 = arith.constant 0 : index
    %121 = vector.load %arg7[%c0_60, %c0_61] : memref<1x32xf32, #tpu.memory_space<vmem>>, vector<1x32xf32>
    %122 = vector.broadcast %121 : vector<1x32xf32> to vector<8x32xf32>
    %123 = arith.addf %120, %122 : vector<8x32xf32>
    %c0_62 = arith.constant 0 : index
    %c0_63 = arith.constant 0 : index
    %124 = vector.load %arg8[%c0_62, %c0_63] : memref<8x32xf32, #tpu.memory_space<vmem>>, vector<8x32xf32>
    tpu.vector_store %arg8[%c0_62, %c0_63], %123 {strides = array<i32>} : memref<8x32xf32, #tpu.memory_space<vmem>>, vector<8x32xf32>,
    return
  }
  func.func @transform_0(%arg0: i32) -> (i32, i32) {
    %c0_i32 = arith.constant 0 : i32
    %c0_i32_0 = arith.constant 0 : i32
    return %arg0, %c0_i32 : i32, i32
  }
  func.func @transform_1(%arg0: i32) -> (i32, i32, i32) {
    %c0_i32 = arith.constant 0 : i32
    %c0_i32_0 = arith.constant 0 : i32
    %c0_i32_1 = arith.constant 0 : i32
    return %arg0, %c0_i32, %c0_i32_0 : i32, i32, i32
  }
  func.func @transform_2(%arg0: i32) -> (i32, i32, i32) {
    %c0_i32 = arith.constant 0 : i32
    %c0_i32_0 = arith.constant 0 : i32
    %c0_i32_1 = arith.constant 0 : i32
    return %arg0, %c0_i32, %c0_i32_0 : i32, i32, i32
  }
  func.func @transform_3(%arg0: i32) -> (i32, i32) {
    %c0_i32 = arith.constant 0 : i32
    %c0_i32_0 = arith.constant 0 : i32
    %c0_i32_1 = arith.constant 0 : i32
    return %c0_i32, %c0_i32_0 : i32, i32
  }
  func.func @transform_4(%arg0: i32) -> (i32, i32) {
    %c0_i32 = arith.constant 0 : i32
    %c0_i32_0 = arith.constant 0 : i32
    %c0_i32_1 = arith.constant 0 : i32
    return %c0_i32, %c0_i32_0 : i32, i32
  }
  func.func @transform_5(%arg0: i32) -> (i32, i32) {
    %c0_i32 = arith.constant 0 : i32
    %c0_i32_0 = arith.constant 0 : i32
    %c0_i32_1 = arith.constant 0 : i32
    return %c0_i32, %c0_i32_0 : i32, i32
  }
  func.func @transform_6(%arg0: i32) -> (i32, i32) {
    %c0_i32 = arith.constant 0 : i32
    %c0_i32_0 = arith.constant 0 : i32
    %c0_i32_1 = arith.constant 0 : i32
    return %c0_i32, %c0_i32_0 : i32, i32
  }
  func.func @transform_7(%arg0: i32) -> (i32, i32) {
    %c0_i32 = arith.constant 0 : i32
    %c0_i32_0 = arith.constant 0 : i32
    return %arg0, %c0_i32 : i32, i32
  }
}

module attributes {stable_mosaic.version = 11 : i64} {
  func.func @mha_kernel(%arg0: i32, %arg1: memref<8x32xbf16, #tpu.memory_space<vmem>>, %arg2: memref<1x1x8xi32, #tpu.memory_space<vmem>>, %arg3: memref<1x8x1xi32, #tpu.memory_space<vmem>>, %arg4: memref<32x96xbf16, #tpu.memory_space<vmem>>, %arg5: memref<1x96xf32, #tpu.memory_space<vmem>>, %arg6: memref<32x32xbf16, #tpu.memory_space<vmem>>, %arg7: memref<1x32xf32, #tpu.memory_space<vmem>>, %arg8: memref<8x32xf32, #tpu.memory_space<vmem>>, %arg9: memref<8x96xbf16, #tpu.memory_space<vmem>>, %arg10: memref<8x32xbf16, #tpu.memory_space<vmem>>) attributes {dimension_semantics = [#tpu.dimension_semantics<parallel>], iteration_bounds = array<i64: 2>, scalar_prefetch = 0 : i64, scratch_operands = 2 : i64, tpu.core_type = #tpu.core_type<tc>, window_params = [{transform_indices = @transform_0, window_bounds = array<i64: 8, 32>}, {transform_indices = @transform_1, window_bounds = array<i64: 1, 1, 8>}, {transform_indices = @transform_2, window_bounds = array<i64: 1, 8, 1>}, {pipeline_mode = #tpu.pipeline_mode<synchronous>, transform_indices = @transform_3, window_bounds = array<i64: 32, 96>}, {pipeline_mode = #tpu.pipeline_mode<synchronous>, transform_indices = @transform_4, window_bounds = array<i64: 1, 96>}, {pipeline_mode = #tpu.pipeline_mode<synchronous>, transform_indices = @transform_5, window_bounds = array<i64: 32, 32>}, {pipeline_mode = #tpu.pipeline_mode<synchronous>, transform_indices = @transform_6, window_bounds = array<i64: 1, 32>}, {transform_indices = @transform_7, window_bounds = array<i64: 8, 32>}]} {
    %c0 = arith.constant 0 : index
    %c0_0 = arith.constant 0 : index
    %0 = vector.load %arg1[%c0, %c0_0] : memref<8x32xbf16, #tpu.memory_space<vmem>>, vector<8x32xbf16>
    %c0_1 = arith.constant 0 : index
    %c0_2 = arith.constant 0 : index
    %1 = vector.load %arg4[%c0_1, %c0_2] : memref<32x96xbf16, #tpu.memory_space<vmem>>, vector<32x96xbf16>
    %cst = arith.constant dense<0.000000e+00> : vector<8x96xf32>
    %2 = tpu.matmul %0, %1, %cst {dimension_numbers = #tpu.dot_dimension_numbers<[1], [0], [0], [1], [0, 0, 1, 1], [], []>} : vector<8x32xbf16>, vector<32x96xbf16>, vector<8x96xf32> -> vector<8x96xf32>
    %c0_3 = arith.constant 0 : index
    %c0_4 = arith.constant 0 : index
    %3 = vector.load %arg5[%c0_3, %c0_4] : memref<1x96xf32, #tpu.memory_space<vmem>>, vector<1x96xf32>
    %4 = vector.broadcast %3 : vector<1x96xf32> to vector<8x96xf32>
    %5 = arith.addf %2, %4 : vector<8x96xf32>
    %6 = arith.truncf %5 : vector<8x96xf32> to vector<8x96xbf16>
    %c0_5 = arith.constant 0 : index
    %c0_6 = arith.constant 0 : index
    %7 = vector.load %arg9[%c0_5, %c0_6] : memref<8x96xbf16, #tpu.memory_space<vmem>>, vector<8x96xbf16>
    tpu.vector_store %arg9[%c0_5, %c0_6], %6 {strides = array<i32>} : memref<8x96xbf16, #tpu.memory_space<vmem>>, vector<8x96xbf16>,
    %c0_7 = arith.constant 0 : index
    %c0_8 = arith.constant 0 : index
    %c0_9 = arith.constant 0 : index
    %8 = vector.load %arg3[%c0_7, %c0_8, %c0_9] : memref<1x8x1xi32, #tpu.memory_space<vmem>>, vector<1x8x1xi32>
    %c0_i32 = arith.constant 0 : i32
    %9 = vector.broadcast %c0_i32 : i32 to vector<1x8x1xi32>
    %10 = arith.cmpi sgt, %8, %9 : vector<1x8x1xi32>
    %c0_10 = arith.constant 0 : index
    %c0_11 = arith.constant 0 : index
    %c0_12 = arith.constant 0 : index
    %11 = vector.load %arg2[%c0_10, %c0_11, %c0_12] : memref<1x1x8xi32, #tpu.memory_space<vmem>>, vector<1x1x8xi32>
    %c0_i32_13 = arith.constant 0 : i32
    %12 = vector.broadcast %c0_i32_13 : i32 to vector<1x1x8xi32>
    %13 = arith.cmpi sgt, %11, %12 : vector<1x1x8xi32>
    %14 = tpu.iota {dimensions = array<i32: 0>} : vector<8x8xi32>
    %15 = tpu.iota {dimensions = array<i32: 1>} : vector<8x8xi32>
    %16 = arith.cmpi sle, %15, %14 : vector<8x8xi32>
    %17 = vector.shape_cast %16 : vector<8x8xi1> to vector<1x8x8xi1>
    %18 = vector.broadcast %10 : vector<1x8x1xi1> to vector<1x8x8xi1>
    %19 = vector.broadcast %13 : vector<1x1x8xi1> to vector<1x8x8xi1>
    %20 = arith.andi %18, %19 : vector<1x8x8xi1>
    %21 = arith.andi %20, %17 : vector<1x8x8xi1>
    %c0_14 = arith.constant 0 : index
    %c0_15 = arith.constant 0 : index
    %22 = vector.load %arg9[%c0_14, %c0_15] : memref<8x96xbf16, #tpu.memory_space<vmem>>, vector<8x8xbf16>
    %23 = vector.shape_cast %22 : vector<8x8xbf16> to vector<1x8x8xbf16>
    %c0_16 = arith.constant 0 : index
    %c32 = arith.constant 32 : index
    %24 = vector.load %arg9[%c0_16, %c32] : memref<8x96xbf16, #tpu.memory_space<vmem>>, vector<8x8xbf16>
    %25 = vector.shape_cast %24 : vector<8x8xbf16> to vector<1x8x8xbf16>
    %c0_17 = arith.constant 0 : index
    %c64 = arith.constant 64 : index
    %26 = vector.load %arg9[%c0_17, %c64] : memref<8x96xbf16, #tpu.memory_space<vmem>>, vector<8x8xbf16>
    %27 = vector.shape_cast %26 : vector<8x8xbf16> to vector<1x8x8xbf16>
    %cst_18 = arith.constant dense<0.000000e+00> : vector<1x8x8xf32>
    %28 = tpu.matmul %23, %25, %cst_18 {dimension_numbers = #tpu.dot_dimension_numbers<[2], [2], [1], [1], [0, 0, 0, 1, 1, 1], [0], [0]>} : vector<1x8x8xbf16>, vector<1x8x8xbf16>, vector<1x8x8xf32> -> vector<1x8x8xf32>
    %cst_19 = arith.constant -1.000000e+09 : f32
    %29 = vector.broadcast %cst_19 : f32 to vector<1x8x8xf32>
    %30 = arith.select %21, %28, %29 : vector<1x8x8xi1>, vector<1x8x8xf32>
    %cst_20 = arith.constant dense<0xFF800000> : vector<1x8xf32>
    %31 = vector.multi_reduction <maximumf>, %30, %cst_20 [2] : vector<1x8x8xf32> to vector<1x8xf32>
    %32 = vector.shape_cast %31 : vector<1x8xf32> to vector<1x8x1xf32>
    %33 = vector.broadcast %32 : vector<1x8x1xf32> to vector<1x8x8xf32>
    %34 = arith.subf %30, %33 : vector<1x8x8xf32>
    %35 = math.exp %34 : vector<1x8x8xf32>
    %cst_21 = arith.constant dense<0.000000e+00> : vector<1x8xf32>
    %36 = vector.multi_reduction <add>, %35, %cst_21 [2] : vector<1x8x8xf32> to vector<1x8xf32>
    %37 = vector.shape_cast %36 : vector<1x8xf32> to vector<1x8x1xf32>
    %38 = tpu.reciprocal %37 {approx = true} : vector<1x8x1xf32> -> vector<1x8x1xf32>
    %39 = vector.broadcast %38 : vector<1x8x1xf32> to vector<1x8x8xf32>
    %40 = arith.mulf %35, %39 : vector<1x8x8xf32>
    %41 = arith.truncf %40 : vector<1x8x8xf32> to vector<1x8x8xbf16>
    %cst_22 = arith.constant dense<0.000000e+00> : vector<1x8x8xf32>
    %42 = tpu.matmul %41, %27, %cst_22 {dimension_numbers = #tpu.dot_dimension_numbers<[2], [1], [1], [2], [0, 0, 0, 1, 1, 2], [0], [0]>} : vector<1x8x8xbf16>, vector<1x8x8xbf16>, vector<1x8x8xf32> -> vector<1x8x8xf32>
    %43 = vector.shape_cast %42 : vector<1x8x8xf32> to vector<8x8xf32>
    %44 = arith.truncf %43 : vector<8x8xf32> to vector<8x8xbf16>
    %c0_23 = arith.constant 0 : index
    %c0_24 = arith.constant 0 : index
    %45 = vector.load %arg10[%c0_23, %c0_24] : memref<8x32xbf16, #tpu.memory_space<vmem>>, vector<8x8xbf16>
    tpu.vector_store %arg10[%c0_23, %c0_24], %44 {strides = array<i32>} : memref<8x32xbf16, #tpu.memory_space<vmem>>, vector<8x8xbf16>,
    %c0_25 = arith.constant 0 : index
    %c8 = arith.constant 8 : index
    %46 = vector.load %arg9[%c0_25, %c8] : memref<8x96xbf16, #tpu.memory_space<vmem>>, vector<8x8xbf16>
    %47 = vector.shape_cast %46 : vector<8x8xbf16> to vector<1x8x8xbf16>
    %c0_26 = arith.constant 0 : index
    %c40 = arith.constant 40 : index
    %48 = vector.load %arg9[%c0_26, %c40] : memref<8x96xbf16, #tpu.memory_space<vmem>>, vector<8x8xbf16>
    %49 = vector.shape_cast %48 : vector<8x8xbf16> to vector<1x8x8xbf16>
    %c0_27 = arith.constant 0 : index
    %c72 = arith.constant 72 : index
    %50 = vector.load %arg9[%c0_27, %c72] : memref<8x96xbf16, #tpu.memory_space<vmem>>, vector<8x8xbf16>
    %51 = vector.shape_cast %50 : vector<8x8xbf16> to vector<1x8x8xbf16>
    %cst_28 = arith.constant dense<0.000000e+00> : vector<1x8x8xf32>
    %52 = tpu.matmul %47, %49, %cst_28 {dimension_numbers = #tpu.dot_dimension_numbers<[2], [2], [1], [1], [0, 0, 0, 1, 1, 1], [0], [0]>} : vector<1x8x8xbf16>, vector<1x8x8xbf16>, vector<1x8x8xf32> -> vector<1x8x8xf32>
    %cst_29 = arith.constant -1.000000e+09 : f32
    %53 = vector.broadcast %cst_29 : f32 to vector<1x8x8xf32>
    %54 = arith.select %21, %52, %53 : vector<1x8x8xi1>, vector<1x8x8xf32>
    %cst_30 = arith.constant dense<0xFF800000> : vector<1x8xf32>
    %55 = vector.multi_reduction <maximumf>, %54, %cst_30 [2] : vector<1x8x8xf32> to vector<1x8xf32>
    %56 = vector.shape_cast %55 : vector<1x8xf32> to vector<1x8x1xf32>
    %57 = vector.broadcast %56 : vector<1x8x1xf32> to vector<1x8x8xf32>
    %58 = arith.subf %54, %57 : vector<1x8x8xf32>
    %59 = math.exp %58 : vector<1x8x8xf32>
    %cst_31 = arith.constant dense<0.000000e+00> : vector<1x8xf32>
    %60 = vector.multi_reduction <add>, %59, %cst_31 [2] : vector<1x8x8xf32> to vector<1x8xf32>
    %61 = vector.shape_cast %60 : vector<1x8xf32> to vector<1x8x1xf32>
    %62 = tpu.reciprocal %61 {approx = true} : vector<1x8x1xf32> -> vector<1x8x1xf32>
    %63 = vector.broadcast %62 : vector<1x8x1xf32> to vector<1x8x8xf32>
    %64 = arith.mulf %59, %63 : vector<1x8x8xf32>
    %65 = arith.truncf %64 : vector<1x8x8xf32> to vector<1x8x8xbf16>
    %cst_32 = arith.constant dense<0.000000e+00> : vector<1x8x8xf32>
    %66 = tpu.matmul %65, %51, %cst_32 {dimension_numbers = #tpu.dot_dimension_numbers<[2], [1], [1], [2], [0, 0, 0, 1, 1, 2], [0], [0]>} : vector<1x8x8xbf16>, vector<1x8x8xbf16>, vector<1x8x8xf32> -> vector<1x8x8xf32>
    %67 = vector.shape_cast %66 : vector<1x8x8xf32> to vector<8x8xf32>
    %68 = arith.truncf %67 : vector<8x8xf32> to vector<8x8xbf16>
    %c0_33 = arith.constant 0 : index
    %c8_34 = arith.constant 8 : index
    %69 = vector.load %arg10[%c0_33, %c8_34] : memref<8x32xbf16, #tpu.memory_space<vmem>>, vector<8x8xbf16>
    tpu.vector_store %arg10[%c0_33, %c8_34], %68 {strides = array<i32>} : memref<8x32xbf16, #tpu.memory_space<vmem>>, vector<8x8xbf16>,
    %c0_35 = arith.constant 0 : index
    %c16 = arith.constant 16 : index
    %70 = vector.load %arg9[%c0_35, %c16] : memref<8x96xbf16, #tpu.memory_space<vmem>>, vector<8x8xbf16>
    %71 = vector.shape_cast %70 : vector<8x8xbf16> to vector<1x8x8xbf16>
    %c0_36 = arith.constant 0 : index
    %c48 = arith.constant 48 : index
    %72 = vector.load %arg9[%c0_36, %c48] : memref<8x96xbf16, #tpu.memory_space<vmem>>, vector<8x8xbf16>
    %73 = vector.shape_cast %72 : vector<8x8xbf16> to vector<1x8x8xbf16>
    %c0_37 = arith.constant 0 : index
    %c80 = arith.constant 80 : index
    %74 = vector.load %arg9[%c0_37, %c80] : memref<8x96xbf16, #tpu.memory_space<vmem>>, vector<8x8xbf16>
    %75 = vector.shape_cast %74 : vector<8x8xbf16> to vector<1x8x8xbf16>
    %cst_38 = arith.constant dense<0.000000e+00> : vector<1x8x8xf32>
    %76 = tpu.matmul %71, %73, %cst_38 {dimension_numbers = #tpu.dot_dimension_numbers<[2], [2], [1], [1], [0, 0, 0, 1, 1, 1], [0], [0]>} : vector<1x8x8xbf16>, vector<1x8x8xbf16>, vector<1x8x8xf32> -> vector<1x8x8xf32>
    %cst_39 = arith.constant -1.000000e+09 : f32
    %77 = vector.broadcast %cst_39 : f32 to vector<1x8x8xf32>
    %78 = arith.select %21, %76, %77 : vector<1x8x8xi1>, vector<1x8x8xf32>
    %cst_40 = arith.constant dense<0xFF800000> : vector<1x8xf32>
    %79 = vector.multi_reduction <maximumf>, %78, %cst_40 [2] : vector<1x8x8xf32> to vector<1x8xf32>
    %80 = vector.shape_cast %79 : vector<1x8xf32> to vector<1x8x1xf32>
    %81 = vector.broadcast %80 : vector<1x8x1xf32> to vector<1x8x8xf32>
    %82 = arith.subf %78, %81 : vector<1x8x8xf32>
    %83 = math.exp %82 : vector<1x8x8xf32>
    %cst_41 = arith.constant dense<0.000000e+00> : vector<1x8xf32>
    %84 = vector.multi_reduction <add>, %83, %cst_41 [2] : vector<1x8x8xf32> to vector<1x8xf32>
    %85 = vector.shape_cast %84 : vector<1x8xf32> to vector<1x8x1xf32>
    %86 = tpu.reciprocal %85 {approx = true} : vector<1x8x1xf32> -> vector<1x8x1xf32>
    %87 = vector.broadcast %86 : vector<1x8x1xf32> to vector<1x8x8xf32>
    %88 = arith.mulf %83, %87 : vector<1x8x8xf32>
    %89 = arith.truncf %88 : vector<1x8x8xf32> to vector<1x8x8xbf16>
    %cst_42 = arith.constant dense<0.000000e+00> : vector<1x8x8xf32>
    %90 = tpu.matmul %89, %75, %cst_42 {dimension_numbers = #tpu.dot_dimension_numbers<[2], [1], [1], [2], [0, 0, 0, 1, 1, 2], [0], [0]>} : vector<1x8x8xbf16>, vector<1x8x8xbf16>, vector<1x8x8xf32> -> vector<1x8x8xf32>
    %91 = vector.shape_cast %90 : vector<1x8x8xf32> to vector<8x8xf32>
    %92 = arith.truncf %91 : vector<8x8xf32> to vector<8x8xbf16>
    %c0_43 = arith.constant 0 : index
    %c16_44 = arith.constant 16 : index
    %93 = vector.load %arg10[%c0_43, %c16_44] : memref<8x32xbf16, #tpu.memory_space<vmem>>, vector<8x8xbf16>
    tpu.vector_store %arg10[%c0_43, %c16_44], %92 {strides = array<i32>} : memref<8x32xbf16, #tpu.memory_space<vmem>>, vector<8x8xbf16>,
    %c0_45 = arith.constant 0 : index
    %c24 = arith.constant 24 : index
    %94 = vector.load %arg9[%c0_45, %c24] : memref<8x96xbf16, #tpu.memory_space<vmem>>, vector<8x8xbf16>
    %95 = vector.shape_cast %94 : vector<8x8xbf16> to vector<1x8x8xbf16>
    %c0_46 = arith.constant 0 : index
    %c56 = arith.constant 56 : index
    %96 = vector.load %arg9[%c0_46, %c56] : memref<8x96xbf16, #tpu.memory_space<vmem>>, vector<8x8xbf16>
    %97 = vector.shape_cast %96 : vector<8x8xbf16> to vector<1x8x8xbf16>
    %c0_47 = arith.constant 0 : index
    %c88 = arith.constant 88 : index
    %98 = vector.load %arg9[%c0_47, %c88] : memref<8x96xbf16, #tpu.memory_space<vmem>>, vector<8x8xbf16>
    %99 = vector.shape_cast %98 : vector<8x8xbf16> to vector<1x8x8xbf16>
    %cst_48 = arith.constant dense<0.000000e+00> : vector<1x8x8xf32>
    %100 = tpu.matmul %95, %97, %cst_48 {dimension_numbers = #tpu.dot_dimension_numbers<[2], [2], [1], [1], [0, 0, 0, 1, 1, 1], [0], [0]>} : vector<1x8x8xbf16>, vector<1x8x8xbf16>, vector<1x8x8xf32> -> vector<1x8x8xf32>
    %cst_49 = arith.constant -1.000000e+09 : f32
    %101 = vector.broadcast %cst_49 : f32 to vector<1x8x8xf32>
    %102 = arith.select %21, %100, %101 : vector<1x8x8xi1>, vector<1x8x8xf32>
    %cst_50 = arith.constant dense<0xFF800000> : vector<1x8xf32>
    %103 = vector.multi_reduction <maximumf>, %102, %cst_50 [2] : vector<1x8x8xf32> to vector<1x8xf32>
    %104 = vector.shape_cast %103 : vector<1x8xf32> to vector<1x8x1xf32>
    %105 = vector.broadcast %104 : vector<1x8x1xf32> to vector<1x8x8xf32>
    %106 = arith.subf %102, %105 : vector<1x8x8xf32>
    %107 = math.exp %106 : vector<1x8x8xf32>
    %cst_51 = arith.constant dense<0.000000e+00> : vector<1x8xf32>
    %108 = vector.multi_reduction <add>, %107, %cst_51 [2] : vector<1x8x8xf32> to vector<1x8xf32>
    %109 = vector.shape_cast %108 : vector<1x8xf32> to vector<1x8x1xf32>
    %110 = tpu.reciprocal %109 {approx = true} : vector<1x8x1xf32> -> vector<1x8x1xf32>
    %111 = vector.broadcast %110 : vector<1x8x1xf32> to vector<1x8x8xf32>
    %112 = arith.mulf %107, %111 : vector<1x8x8xf32>
    %113 = arith.truncf %112 : vector<1x8x8xf32> to vector<1x8x8xbf16>
    %cst_52 = arith.constant dense<0.000000e+00> : vector<1x8x8xf32>
    %114 = tpu.matmul %113, %99, %cst_52 {dimension_numbers = #tpu.dot_dimension_numbers<[2], [1], [1], [2], [0, 0, 0, 1, 1, 2], [0], [0]>} : vector<1x8x8xbf16>, vector<1x8x8xbf16>, vector<1x8x8xf32> -> vector<1x8x8xf32>
    %115 = vector.shape_cast %114 : vector<1x8x8xf32> to vector<8x8xf32>
    %116 = arith.truncf %115 : vector<8x8xf32> to vector<8x8xbf16>
    %c0_53 = arith.constant 0 : index
    %c24_54 = arith.constant 24 : index
    %117 = vector.load %arg10[%c0_53, %c24_54] : memref<8x32xbf16, #tpu.memory_space<vmem>>, vector<8x8xbf16>
    tpu.vector_store %arg10[%c0_53, %c24_54], %116 {strides = array<i32>} : memref<8x32xbf16, #tpu.memory_space<vmem>>, vector<8x8xbf16>,
    %c0_55 = arith.constant 0 : index
    %c0_56 = arith.constant 0 : index
    %118 = vector.load %arg10[%c0_55, %c0_56] : memref<8x32xbf16, #tpu.memory_space<vmem>>, vector<8x32xbf16>
    %c0_57 = arith.constant 0 : index
    %c0_58 = arith.constant 0 : index
    %119 = vector.load %arg6[%c0_57, %c0_58] : memref<32x32xbf16, #tpu.memory_space<vmem>>, vector<32x32xbf16>
    %cst_59 = arith.constant dense<0.000000e+00> : vector<8x32xf32>
    %120 = tpu.matmul %118, %119, %cst_59 {dimension_numbers = #tpu.dot_dimension_numbers<[1], [0], [0], [1], [0, 0, 1, 1], [], []>} : vector<8x32xbf16>, vector<32x32xbf16>, vector<8x32xf32> -> vector<8x32xf32>
    %c0_60 = arith.constant 0 : index
    %c0_61 = arith.constant 0 : index
    %121 = vector.load %arg7[%c0_60, %c0_61] : memref<1x32xf32, #tpu.memory_space<vmem>>, vector<1x32xf32>
    %122 = vector.broadcast %121 : vector<1x32xf32> to vector<8x32xf32>
    %123 = arith.addf %120, %122 : vector<8x32xf32>
    %c0_62 = arith.constant 0 : index
    %c0_63 = arith.constant 0 : index
    %124 = vector.load %arg8[%c0_62, %c0_63] : memref<8x32xf32, #tpu.memory_space<vmem>>, vector<8x32xf32>
    tpu.vector_store %arg8[%c0_62, %c0_63], %123 {strides = array<i32>} : memref<8x32xf32, #tpu.memory_space<vmem>>, vector<8x32xf32>,
    return
  }
  func.func @transform_0(%arg0: i32) -> (i32, i32) {
    %c0_i32 = arith.constant 0 : i32
    %c0_i32_0 = arith.constant 0 : i32
    return %arg0, %c0_i32 : i32, i32
  }
  func.func @transform_1(%arg0: i32) -> (i32, i32, i32) {
    %c0_i32 = arith.constant 0 : i32
    %c0_i32_0 = arith.constant 0 : i32
    %c0_i32_1 = arith.constant 0 : i32
    return %arg0, %c0_i32, %c0_i32_0 : i32, i32, i32
  }
  func.func @transform_2(%arg0: i32) -> (i32, i32, i32) {
    %c0_i32 = arith.constant 0 : i32
    %c0_i32_0 = arith.constant 0 : i32
    %c0_i32_1 = arith.constant 0 : i32
    return %arg0, %c0_i32, %c0_i32_0 : i32, i32, i32
  }
  func.func @transform_3(%arg0: i32) -> (i32, i32) {
    %c0_i32 = arith.constant 0 : i32
    %c0_i32_0 = arith.constant 0 : i32
    %c0_i32_1 = arith.constant 0 : i32
    return %c0_i32, %c0_i32_0 : i32, i32
  }
  func.func @transform_4(%arg0: i32) -> (i32, i32) {
    %c0_i32 = arith.constant 0 : i32
    %c0_i32_0 = arith.constant 0 : i32
    %c0_i32_1 = arith.constant 0 : i32
    return %c0_i32, %c0_i32_0 : i32, i32
  }
  func.func @transform_5(%arg0: i32) -> (i32, i32) {
    %c0_i32 = arith.constant 0 : i32
    %c0_i32_0 = arith.constant 0 : i32
    %c0_i32_1 = arith.constant 0 : i32
    return %c0_i32, %c0_i32_0 : i32, i32
  }
  func.func @transform_6(%arg0: i32) -> (i32, i32) {
    %c0_i32 = arith.constant 0 : i32
    %c0_i32_0 = arith.constant 0 : i32
    %c0_i32_1 = arith.constant 0 : i32
    return %c0_i32, %c0_i32_0 : i32, i32
  }
  func.func @transform_7(%arg0: i32) -> (i32, i32) {
    %c0_i32 = arith.constant 0 : i32
    %c0_i32_0 = arith.constant 0 : i32
    return %arg0, %c0_i32 : i32, i32
  }
}

</mosaic_0001>

<bundles_post_ra>
// kernel: tpu_custom_call.1
= control target key start
LH: loop header
LB: loop body
LE: loop exit
PB: predicated region body
PF: predicated region fallthrough
CT: control target
= control target key end

     0   :  { %s1372_s0 = inlined_call_operand.hbm [shape: bf16[16,32], index: 0, kind: input, shape index: {}]   ;;  %s1373_s1 = inlined_call_operand.vmem [shape: s32[2,1,8], index: 1, kind: input, shape index: {}]   ;;  %s1374_s2 = inlined_call_operand.vmem [shape: s32[2,8,1], index: 2, kind: input, shape index: {}]   ;;  %s1375_s3 = inlined_call_operand.vmem [shape: bf16[32,96], index: 3, kind: input, shape index: {}]   ;;  %s1376_s4 = inlined_call_operand.vmem [shape: f32[1,96], index: 4, kind: input, shape index: {}]   ;;  %s1377_s5 = inlined_call_operand.hbm [shape: bf16[32,32], index: 5, kind: input, shape index: {}]   ;;  %s1378_s6 = inlined_call_operand.vmem [shape: f32[1,32], index: 6, kind: input, shape index: {}]   ;;  %s1379_s7 = inlined_call_operand.hbm [shape: f32[16,32], index: 7, kind: output, shape index: {}]  }
   0x1   :  { %1380 = sst [smem:[#allocation13_spill]] %s1377_s5 }
   0x2   :  { %12 = vsyncpa [#allocation5], 0 }
   0x3   :  { %14 = vsyncpa [#allocation5 + $0x1], 0 }
   0x4   :  { %15 = vsyncpa [#allocation8], 0 }
   0x5   :  { %16 = vsyncpa [#allocation6], 0 }
   0x6   :  { %18 = vsyncpa [#allocation6 + $0x1], 0  ;;  %s1157_s24 = smov 0   ;;  %s1159_s25 = smov 0  }
   0x7   :  { %s1161_s26 = smov 0   ;;  %s1163_s27 = smov 0  }
   0x8 LB: > { %s1381_s5 = sld [smem:[#allocation13_spill]]  ;;  %s1181_s8 = sadd.s32 4294967295, %s1097_s27   ;;  %s1097_s27 = sphi %s1163_s27, %s1393_s27   ;;  %s1093_s26 = sphi %s1161_s26, %s1392_s26   ;;  %s1089_s25 = sphi %s1159_s25, %s1391_s25   ;;  %s1085_s24 = sphi %s1157_s24, %s1390_s24  }
   0x9   : > { %p829_p0 = scmp.ge.s32.totalorder %s1097_s27, 1  ;;  %p45_p1 = scmp.eq.s32.totalorder %s1181_s8, 0 }
   0xa   : > { %p217_p2 = scmp.lt.s32.totalorder %s1097_s27, 3  ;;  %s1099_s10 = smov [#allocation7]  }
   0xb   : > { %s236_s11 = sshll.u32 %s1099_s10, 4  ;;  %s1100_s12 = smov 64   ;;  %s237_s11 = int_to_ptr.vmem [resolvable:$true] %s236_s11 }
   0xc   : > { %p1186_p3 = pnand %p829_p0, %p217_p2  ;;  %s1101_s13 = smov 4  }
   0xd   : > { %s828_s14 = sadd.s32 4294967294, %s1097_s27   ;;  %s1197_s15 = sadd.s32 1, %s1097_s27  }
   0xe   : > { %s234_s30 = sshll.u32 %s1381_s5, 4  ;;  %p881_p4 = pneg %p1186_p3  ;;  %s235_s30 = int_to_ptr.hbm [resolvable:$true] %s234_s30 }
   0xf   : > { %s31_s16 = sadd.s32 1, %s1093_s26  ;;  %s28_s17 = ssub.s32 %s1097_s27, %s1197_s15 }
  0x10   : > { %p882_p6 = pnand %p881_p4, %p45_p1  ;;  %p38_p7 = scmp.ne.s32.totalorder %s1093_s26, %s1089_s25 }
  0x11   : > { %p29_p8 = scmp.eq.s32.totalorder %s28_s17, 0  ;;  %p39_p9 = scmp.eq.s32.totalorder %s1097_s27, 0 }
  0x12   : > { %884 = dma.hbm_to_vmem [thread:$0]  (!%p882_p6), %s235_s30, 256, %s237_s11, [#allocation8], %s1100_s12, %s1100_s12, %s1101_s13  }
  0x13   : > { %p44_p10 = scmp.ne.s32.totalorder %s1089_s25, %s1085_s24  ;;  %p204_p11 = scmp.eq.s32.totalorder %s1181_s8, 1 }
  0x14   : > { %s1209_s18 = scalar_select %p29_p8, %s1093_s26, %s31_s16  }
  0x15   : > { %p1213_p12 = por %p45_p1, %p44_p10  ;;  %p1217_p13 = por %p204_p11, %p38_p7 }
  0x16   : > { %p210_p0 = scmp.eq.s32.totalorder %s828_s14, 1  ;;  %p40_p2 = por %p39_p9, %p38_p7 }
  0x17   : > { %s253_s21 = sand.u32 1, %s1093_s26   ;;  %p894_p6 = scmp.lt.s32.totalorder %s1097_s27, 2 }
  0x18   : > { %p1222_p4 = por %p210_p0, %p44_p10  ;;  %s832_s23 = sshll.u32 %s253_s21, 2 }
  0x19   : > { %s833_s28 = sshll.u32 %s1097_s27, 2  ;;  %s257_s12 = scalar_lea.vmem [#allocation4], %s832_s23 }
  0x1a   : > { %s261_s10 = scalar_lea.hbm %s1372_s0, %s833_s28  ;;  %s265_s13 = sshll.u32 %s257_s12, 4  ;;  %s266_s13 = int_to_ptr.vmem [resolvable:$true] %s265_s13 }
  0x1b   : > { %s263_s11 = sshll.u32 %s261_s10, 4  ;;  %p1231_p8 = pnand %p894_p6, %p40_p2  ;;  %s264_s11 = int_to_ptr.hbm [resolvable:$true] %s263_s11 }
  0x1c   : > { %s254_s16 = scalar_lea.sflag [#allocation5], %s253_s21  ;;  %s997_s17 = sshra.s32 %s264_s11, 4  ;;  %s998_s17 = int_to_ptr.hbm [resolvable:$true] %s997_s17 }
  0x1d   : > { %s999_s5 = scalar_lea.hbm %s998_s17, 4  ;;  %p1001_p9 = pneg %p1231_p8 }
  0x1e   : > { %p1000_p7 = scmp.ne.s32.totalorder %s998_s17, %s999_s5  ;;  %s1004_s23 = scalar_lea.hbm %s1372_s0, 8 }
  0x1f   : > { %p1005_p0 = scmp.lt.s32.totalorder %s998_s17, %s1372_s0  ;;  %p1006_p2 = scmp.lt.s32.totalorder %s1004_s23, %s999_s5 }
  0x20   : > { %p1002_p10 = pnand %p1001_p9, %p1000_p7 }
  0x21   : > { %p1007_p6 = por %p1006_p2, %p1005_p0 }
  0x22   : > { %p1003_p11 = pneg %p1002_p10 }
  0x24   : > { %p1008_p5 = pnand %p1007_p6, %p1003_p11 }
  0x26   : > { %1011 = shalt.err (!%p1008_p5)
}
  0x27   : > { %888 = dma.hbm_to_vmem [thread:$0]  (!%p1231_p8), %s264_s11, 64, %s266_s13, %s254_s16  }
  0x28   : > { %287 = sbr.rel (%p1186_p3) target bundleno = 1129 (0x469), region = 48  ;;  %s1248_s21 = sand.u32 (!%p1186_p3), 1, %s1089_s25  }
  0x29   : > { %s835_s12 = sshll.u32 (!%p1186_p3), %s1248_s21, 2  ;;  %s290_s28 = scalar_lea.sflag (!%p1186_p3), [#allocation5], %s1248_s21 }
  0x2a   : > { %s293_s29 = scalar_lea.vmem (!%p1186_p3), [#allocation4], %s835_s12 }
  0x2d   : > { %1072 = dma.done.wait (%p1213_p12), %s290_s28, 64  }
  0x2e   : > { %1074 = vsyncadd (%p1213_p12), %s290_s28, 4294967232 }
  0x2f   : > { %1076 = dma.done.wait (%p45_p1), [#allocation8], 256  }
  0x30   : > { %1078 = vsyncadd (%p45_p1), [#allocation8], 4294967040  ;;  %v870_v0 = vld [vmem:[%s1375_s3 + $0x8] sm:$0xff]  ;;  %v869_v1 = vld [vmem:[%s1375_s3] sm:$0xff]  ;;  %vm366_vm0 = vcmask 261120   ;;  %vm384_vm1 = vcmask 781312   ;;  %v390_v36 = vlaneseq }
  0x31   : > { %376 = vmatpush.bf16.msra.mxu0 %v870_v0  ;;  %v345_v2 = vld [vmem:[%s293_s29] sm:$0xf]  ;;  %v949_v3 = vld [vmem:[%s1376_s4] ss:$0 sm:$0xff]  ;;  %s1102_s16 = smov 104   ;;  %s1103_s17 = smov 120  }
  0x32   : > { %s1104_s23 = smov 96   ;;  %s1105_s30 = smov 80   ;;  %v1109_v21 = vmov 0   ;;  %vm411_vm2 = vcmask 64512   ;;  %v391_v39 = vshrl.u32 %v390_v36, 7  ;;  %v393_v40 = vand.u32 127, %v390_v36 }
  0x33   : > { %s1106_s10 = smov 72   ;;  %s1107_s12 = smov 88   ;;  %947 = vset.pattern.permute.xlu1 %v1109_v21  ;;  %948 = vset.pattern.permute.xlu0 %v1109_v21  ;;  %vm449_vm10 = vcmask 1043456   ;;  %vm467_vm11 = vcmask 60416   ;;  %vm535_vm12 = vcmask 126016   ;;  %vm603_vm13 = vcmask 191616  }
  0x34   : > { %s1108_s28 = smov 112   ;;  %p337_p1 = scmp.lt.s32.totalorder %s1181_s8, 1  ;;  %vm394_vm7 = vcmp.le.s32.totalorder %v393_v40, %v391_v39  ;;  %vm671_vm14 = vcmask 257216  }
  0x35   : > { %377 = vmatpush.bf16.msra.mxu0 %v869_v1  ;;  %s837_s9 = sshll.u32 %s1248_s21, 3 }
  0x36   : > { %s338_s29 = scalar_select %p337_p1, %s1181_s8, 1 }
  0x38   : > { %847 = vmatmul.msk.bf16.vlgmr.msra.gmra.mxu0 %vm366_vm0, %v345_v2  ;;  %s838_s5 = sshll.u32 %s338_s29, 3 }
  0x39   : > { %s343_s13 = scalar_lea.vmem %s1374_s2, %s838_s5  ;;  %s866_s5 = sshll.u32 %s1181_s8, 3 }
  0x3a   : > { %v386_v22 = vld [vmem:[%s343_s13] sm:$0xff]  ;;  %s722_s19 = scalar_lea.hbm %s1379_s7, %s866_s5  ;;  %s712_s8 = scalar_lea.sflag [#allocation6], %s1248_s21 }
  0x3b   : > { %vm387_vm3 = vcmp.gt.s32.totalorder %v386_v22, 0  ;;  %s1047_s5 = scalar_lea.hbm %s1379_s7, 16 }
  0x3c   : > { %v395_v25 = vsel %vm387_vm3, 1, %v1109_v21 }
  0xb5   : > { %v379_v4 = vpop.f32.mrf.mxu0 }
  0xb6   : > { %v380_v5 = vadd.f32 %v949_v3, %v379_v4 }
  0xb8   : > { %v383_v6 = vpack.c.bf16 %v380_v5, %v380_v5 }
  0xba   : > { %385 = vst.msk [vmem:[#allocation2] sm:$0xf] %vm384_vm1, %v383_v6 }
  0xbd   : > { %v381_v7 = vpop.f32.mrf.mxu0 }
  0xc1   : > { %v605_v8 = vld [vmem:[#allocation2] sm:$0xf] }
  0xc2   : > { %v469_v9 = vld [vmem:[#allocation2] sm:$0xf]  ;;  %v607_v11 = vunpack.c.l.b16 %v605_v8 }
  0xc3   : > { %v405_v10 = vld [vmem:[#allocation2] sm:$0xf]  ;;  %v471_v12 = vunpack.c.l.b16 %v469_v9 }
  0xc4   : > { %v407_v13 = vunpack.c.l.b16 %v405_v10  ;;  %v1270_v14 = vpack.c.b16 %v607_v11, %v607_v11  ;;  %v537_v17 = vld [vmem:[#allocation2] sm:$0xf] }
  0xc5   : > { %v1272_v15 = vpack.c.b16 %v471_v12, %v471_v12  ;;  %v539_v18 = vunpack.c.l.b16 %v537_v17 }
  0xc6   : > { %v1274_v16 = vpack.c.b16 %v407_v13, %v407_v13  ;;  %609 = vrot.lane.b32.xlu2 %v1270_v14, %s1102_s16  ;;  %s339_s16 = scalar_lea.vmem %s1373_s1, %s338_s29  ;;  %s1116_s29 = smov 16  }
  0xc7   : > { %473 = vrot.lane.b32.xlu1 %v1272_v15, %s1103_s17  ;;  %v1279_v19 = vpack.c.b16 %v539_v18, %v539_v18  ;;  %v388_v29 = vld [vmem:[%s339_s16] sm:$0x1]  ;;  %s1110_s17 = smov 64  }
  0xc8   : > { %409 = vrot.lane.b32.xlu0 %v1274_v16, %s1104_s23  ;;  %vm389_vm4 = vcmp.gt.s32.totalorder %v388_v29, 0  ;;  %s1111_s23 = smov 40  }
  0xc9   : > { %v400_v30 = vsel %vm389_vm4, 1, %v1109_v21 }
  0xca   : > { %v401_v37 = vperm.slane %v400_v30, 0 }
  0xcc   : > { %vm402_vm5 = vcmp.eq.s32.totalorder %v401_v37, 1 }
  0xce   : > { %543 = vrot.lane.b32.xlu2 %v1279_v19, %s1105_s30  ;;  %s1112_s30 = smov 56  }
  0xcf   : > { %611 = vrot.lane.b32.xlu1 %v1270_v14, %s1106_s10  ;;  %s1113_s10 = smov 48  }
  0xd0   : > { %475 = vrot.lane.b32.xlu0 %v1272_v15, %s1107_s12  ;;  %s1114_s12 = smov 8  }
  0xd7   : > { %397 = vperm.xlu1 %947, %v395_v25  }
  0xd8   : > { %541 = vrot.lane.b32.xlu0 %v1279_v19, %s1108_s28  ;;  %s1115_s28 = smov 24  }
 0x120   : > { %v610_v20 = vpop.permute.xlu2 %609 }
 0x128   : > { %v544_v23 = vpop.permute.xlu2 %543 }
 0x129   : > { %v549_v24 = vsel %vm411_vm2, %v544_v23, 0 }
 0x12a   : > { %558 = vmatpush.bf16.xpose.msrb.mxu0 %v549_v24 }
 0x139   : > { %v474_v26 = vpop.permute.xlu1 %473 }
 0x13a   : > { %v410_v27 = vpop.permute.xlu0 %409 }
 0x13b   : > { %v416_v28 = vsel %vm411_vm2, %v410_v27, 0 }
 0x13c   : > { %425 = vmatpush.bf16.xpose.msra.mxu1 %v416_v28 }
 0x141   : > { %v612_v31 = vpop.permute.xlu1 %611 }
 0x142   : > { %v476_v32 = vpop.permute.xlu0 %475  ;;  %v617_v33 = vsel %vm411_vm2, %v612_v31, 0 }
 0x143   : > { %848 = vmatmul.msk.bf16.vlgmr.msra.gmra.mxu1 %vm411_vm2, %v405_v10  ;;  %v481_v34 = vsel %vm411_vm2, %v476_v32, 0 }
 0x144   : > { %490 = vmatpush.bf16.xpose.msra.mxu3 %v481_v34 }
 0x149   : > { %v398_v38 = vpop.permute.xlu1 %397 }
 0x14a   : > { %v542_v35 = vpop.permute.xlu0 %541  ;;  %vm399_vm6 = vcmp.eq.s32.totalorder %v398_v38, 1 }
 0x14b   : > { %850 = vmatmul.msk.bf16.vlgmr.msra.gmra.mxu3 %vm411_vm2, %v474_v26  ;;  %852 = vmatmul.msk.bf16.vlgmr.msrb.gmra.mxu0 %vm411_vm2, %v542_v35  ;;  %vm403_vm8 = vmand %vm399_vm6, %vm402_vm5 }
 0x14c   : > { %626 = vmatpush.bf16.xpose.msrb.mxu3 %v617_v33  ;;  %vm1301_vm9 = vmand %vm403_vm8, %vm394_vm7 }
 0x15b   : > { %854 = vmatmul.msk.bf16.vlgmr.msrb.gmra.mxu3 %vm411_vm2, %v610_v20 }
 0x1c0   : > { %v427_v42 = vpop.f32.mrf.mxu1 }
 0x1c1   : > { %v431_v43 = vsel %vm1301_vm9, %v427_v42, -1e+09 }
 0x1c2   : > { %v432_v44 = vsel %vm411_vm2, %v431_v43, -inf }
 0x1c3   : > { %433 = vmax.xlane.f32.xlu2 %v432_v44 }
 0x1c8   : > { %v429_v45 = vpop.f32.mrf.mxu1  ;;  %v560_v46 = vpop.f32.mrf.mxu0 }
 0x1c9   : > { %v564_v47 = vsel %vm1301_vm9, %v560_v46, -1e+09 }
 0x1ca   : > { %v565_v48 = vsel %vm411_vm2, %v564_v47, -inf }
 0x1cb   : > { %566 = vmax.xlane.f32.xlu2 %v565_v48 }
 0x1ce   : > { %v492_v49 = vpop.f32.mrf.mxu3 }
 0x1cf   : > { %v496_v50 = vsel %vm1301_vm9, %v492_v49, -1e+09 }
 0x1d0   : > { %v562_v51 = vpop.f32.mrf.mxu0  ;;  %v497_v52 = vsel %vm411_vm2, %v496_v50, -inf }
 0x1d1   : > { %498 = vmax.xlane.f32.xlu0 %v497_v52  ;;  %v871_v51 = vld [vmem:[#allocation7] sm:$0xff] }
 0x1d6   : > { %v494_v53 = vpop.f32.mrf.mxu3 }
 0x1de   : > { %v628_v54 = vpop.f32.mrf.mxu3 }
 0x1df   : > { %v632_v55 = vsel %vm1301_vm9, %v628_v54, -1e+09 }
 0x1e0   : > { %v633_v56 = vsel %vm411_vm2, %v632_v55, -inf }
 0x1e1   : > { %634 = vmax.xlane.f32.xlu1 %v633_v56  ;;  %v950_v56 = vld [vmem:[%s1378_s6] ss:$0 sm:$0xff] }
 0x1e5   : > { %444 = vrot.lane.b32.xlu0 %v1274_v16, %s1110_s17  ;;  %s336_s17 = scalar_lea.vmem [#allocation9], %s837_s9 }
 0x1e6   : > { %v630_v57 = vpop.f32.mrf.mxu3 }
 0x1ed   : > { %645 = vrot.lane.b32.xlu0 %v1270_v14, %s1111_s23  ;;  %s724_s23 = sshll.u32 %s336_s17, 4  ;;  %s725_s23 = int_to_ptr.vmem [resolvable:$true] %s724_s23 }
 0x236   : > { %v434_v58 = vpop.xlane.xlu2 %433 }
 0x237   : > { %v435_v59 = vsub.f32 %v431_v43, %v434_v58 }
 0x239   : > { %v436_v60 = vmul.f32 1.442695, %v435_v59 }
 0x23b   : > { %951 = vpow2.f32 %v436_v60 }
 0x23e   : > { %v567_v61 = vpop.xlane.xlu2 %566 }
 0x23f   : > { %v568_v62 = vsub.f32 %v564_v47, %v567_v61 }
 0x241   : > { %v952_v63 = vpop.eup %951  ;;  %v569_v0 = vmul.f32 1.442695, %v568_v62 }
 0x242   : > { %v438_v1 = vsel %vm411_vm2, %v952_v63, 0.0 }
 0x243   : > { %953 = vpow2.f32 %v569_v0  ;;  %439 = vadd.xlane.f32.xlu2 %v438_v1 }
 0x244   : > { %v499_v2 = vpop.xlane.xlu0 %498 }
 0x245   : > { %v500_v3 = vsub.f32 %v496_v50, %v499_v2  ;;  %v872_v50 = vld [vmem:[#allocation7 + $0x8] sm:$0xff] }
 0x246   : > { %703 = vmatpush.bf16.msra.mxu0 %v872_v50 }
 0x247   : > { %v501_v4 = vmul.f32 1.442695, %v500_v3 }
 0x249   : > { %v954_v5 = vpop.eup %953  ;;  %955 = vpow2.f32 %v501_v4 }
 0x24a   : > { %v571_v6 = vsel %vm411_vm2, %v954_v5, 0.0  ;;  %704 = vmatpush.bf16.msra.mxu0 %v871_v51 }
 0x24b   : > { %572 = vadd.xlane.f32.xlu1 %v571_v6 }
 0x24f   : > { %v956_v7 = vpop.eup %955 }
 0x250   : > { %v503_v8 = vsel %vm411_vm2, %v956_v7, 0.0 }
 0x253   : > { %504 = vadd.xlane.f32.xlu1 %v503_v8 }
 0x254   : > { %v635_v9 = vpop.xlane.xlu1 %634 }
 0x255   : > { %v636_v10 = vsub.f32 %v632_v55, %v635_v9 }
 0x257   : > { %v637_v11 = vmul.f32 1.442695, %v636_v10  ;;  %v445_v12 = vpop.permute.xlu0 %444 }
 0x258   : > { %v451_v13 = vsel %vm449_vm10, %v445_v12, 0 }
 0x259   : > { %957 = vpow2.f32 %v637_v11  ;;  %460 = vmatpush.bf16.msra.mxu2 %v451_v13 }
 0x25b   : > { %509 = vrot.lane.b32.xlu2 %v1272_v15, %s1112_s30  ;;  %s726_s30 = sshll.u32 %s722_s19, 4  ;;  %s727_s30 = int_to_ptr.hbm [resolvable:$true] %s726_s30 }
 0x25f   : > { %v958_v14 = vpop.eup %957  ;;  %v646_v23 = vpop.permute.xlu0 %645 }
 0x260   : > { %v639_v16 = vsel %vm411_vm2, %v958_v14, 0.0  ;;  %v651_v15 = vsel %vm449_vm10, %v646_v23, 0 }
 0x261   : > { %640 = vadd.xlane.f32.xlu1 %v639_v16 }
 0x27a   : > { %577 = vrot.lane.b32.xlu1 %v1279_v19, %s1113_s10  ;;  %s1041_s10 = sshra.s32 %s727_s30, 4  ;;  %s1042_s10 = int_to_ptr.hbm [resolvable:$true] %s1041_s10 }
 0x27b   : > { %p1048_p8 = scmp.lt.s32.totalorder %s1042_s10, %s1379_s7 }
 0x2b6   : > { %v440_v17 = vpop.xlane.xlu2 %439 }
 0x2b7   : > { %959 = vrcp.f32 %v440_v17 }
 0x2bd   : > { %v960_v18 = vpop.eup %959 }
 0x2be   : > { %v573_v20 = vpop.xlane.xlu1 %572  ;;  %v510_v21 = vpop.permute.xlu2 %509  ;;  %v442_v22 = vmul.f32 %v960_v18, %v952_v63 }
 0x2bf   : > { %v515_v24 = vsel %vm449_vm10, %v510_v21, 0 }
 0x2c0   : > { %524 = vmatpush.bf16.msrb.mxu2 %v515_v24  ;;  %v443_v25 = vpack.c.bf16 %v442_v22, %v442_v22 }
 0x2c2   : > { %849 = vmatmul.msk.bf16.vlgmr.msra.gmra.mxu2 %vm411_vm2, %v443_v25 }
 0x2c4   : > { %660 = vmatpush.bf16.msra.mxu2 %v651_v15 }
 0x2c6   : > { %v505_v26 = vpop.xlane.xlu1 %504 }
 0x2c7   : > { %961 = vrcp.f32 %v505_v26 }
 0x2cd   : > { %v962_v27 = vpop.eup %961 }
 0x2ce   : > { %v507_v19 = vmul.f32 %v962_v27, %v956_v7 }
 0x2d0   : > { %v508_v28 = vpack.c.bf16 %v507_v19, %v507_v19 }
 0x2d2   : > { %851 = vmatmul.msk.bf16.vlgmr.msrb.gmra.mxu2 %vm411_vm2, %v508_v28 }
 0x2d4   : > { %v641_v29 = vpop.xlane.xlu1 %640 }
 0x2d5   : > { %963 = vrcp.f32 %v641_v29 }
 0x2d6   : > { %965 = vrcp.f32 %v573_v20 }
 0x2db   : > { %v964_v30 = vpop.eup %963 }
 0x2dc   : > { %v643_v31 = vmul.f32 %v964_v30, %v958_v14  ;;  %v966_v33 = vpop.eup %965 }
 0x2dd   : > { %v575_v34 = vmul.f32 %v966_v33, %v954_v5 }
 0x2de   : > { %v644_v32 = vpack.c.bf16 %v643_v31, %v643_v31 }
 0x2df   : > { %v576_v37 = vpack.c.bf16 %v575_v34, %v575_v34 }
 0x2e2   : > { %855 = vmatmul.msk.bf16.vlgmr.msra.gmra.mxu2 %vm411_vm2, %v644_v32 }
 0x2ec   : > { %v578_v35 = vpop.permute.xlu1 %577 }
 0x2ed   : > { %v583_v36 = vsel %vm449_vm10, %v578_v35, 0 }
 0x2ee   : > { %592 = vmatpush.bf16.msrb.mxu1 %v583_v36 }
 0x2f1   : > { %853 = vmatmul.msk.bf16.vlgmr.msrb.gmra.mxu1 %vm411_vm2, %v576_v37 }
 0x345   : > { %v462_v38 = vpop.f32.mrf.mxu2 }
 0x346   : > { %v466_v39 = vpack.c.bf16 %v462_v38, %v462_v38 }
 0x348   : > { %468 = vst.msk [vmem:[#allocation3] sm:$0xf] %vm467_vm11, %v466_v39 }
 0x34d   : > { %v464_v40 = vpop.f32.mrf.mxu2 }
 0x355   : > { %v526_v41 = vpop.f32.mrf.mxu2 }
 0x356   : > { %v530_v42 = vpack.c.bf16 %v526_v41, %v526_v41 }
 0x358   : > { %532 = vrot.lane.b32.xlu0 %v530_v42, %s1114_s12  ;;  %s1043_s12 = scalar_lea.hbm %s1042_s10, 8 }
 0x359   : > { %p1044_p3 = scmp.ne.s32.totalorder %s1042_s10, %s1043_s12  ;;  %p1049_p7 = scmp.lt.s32.totalorder %s1047_s5, %s1043_s12 }
 0x35b   : > { %p1045_p5 = pnand %p1044_p3, %p1217_p13  ;;  %p1050_p9 = por %p1049_p7, %p1048_p8 }
 0x35d   : > { %v528_v43 = vpop.f32.mrf.mxu2  ;;  %p1046_p12 = pneg %p1045_p5 }
 0x35f   : > { %p1051_p10 = pnand %p1050_p9, %p1046_p12 }
 0x365   : > { %v662_v44 = vpop.f32.mrf.mxu2 }
 0x366   : > { %v666_v45 = vpack.c.bf16 %v662_v44, %v662_v44 }
 0x368   : > { %668 = vrot.lane.b32.xlu0 %v666_v45, %s1115_s28 }
 0x36d   : > { %v664_v46 = vpop.f32.mrf.mxu2 }
 0x36e   : > { %v594_v47 = vpop.f32.mrf.mxu1 }
 0x36f   : > { %v598_v48 = vpack.c.bf16 %v594_v47, %v594_v47 }
 0x371   : > { %600 = vrot.lane.b32.xlu2 %v598_v48, %s1116_s29 }
 0x376   : > { %v596_v49 = vpop.f32.mrf.mxu1 }
 0x3ca   : > { %v533_v52 = vpop.permute.xlu0 %532 }
 0x3cb   : > { %536 = vst.msk [vmem:[#allocation3] sm:$0xf] %vm535_vm12, %v533_v52  ;;  %v601_v53 = vpop.permute.xlu2 %600 }
 0x3cc   : > { %604 = vst.msk [vmem:[#allocation3] sm:$0xf] %vm603_vm13, %v601_v53 }
 0x3da   : > { %v669_v54 = vpop.permute.xlu0 %668 }
 0x3db   : > { %672 = vst.msk [vmem:[#allocation3] sm:$0xf] %vm671_vm14, %v669_v54 }
 0x3e2   : > { %v673_v55 = vld [vmem:[#allocation3] sm:$0xf] }
 0x3e3   : > { %864 = vmatmul.msk.bf16.vlgmr.msra.gmra.mxu0 %vm366_vm0, %v673_v55 }
 0x460   : > { %v706_v57 = vpop.f32.mrf.mxu0 }
 0x461   : > { %v707_v58 = vadd.f32 %v950_v56, %v706_v57 }
 0x463   : > { %710 = vst.msk [vmem:[%s336_s17] sm:$0xff] %vm366_vm0, %v707_v58 }
 0x464   : > { %1054 = shalt.err (!%p1051_p10)
}
 0x465   : > { %879 = dma.vmem_to_hbm [thread:$0]  (%p1217_p13), %s725_s23, 128, %s727_s30, %s712_s8  }
 0x468   : > { %v708_v59 = vpop.f32.mrf.mxu0 }
 0x469 PF: > { %s738_s21 = sand.u32 1, %s1085_s24   ;;  %p1389_p11 = scmp.ge.s32.totalorder %s1097_s27, 2 }
 0x46a   : > { %s739_s13 = scalar_lea.sflag [#allocation6], %s738_s21 }
 0x46b   : > { %p890_p0 = pnand %p1389_p11, %p1222_p4 }
 0x46d   : > { %p891_p2 = pneg %p890_p0 }
 0x46f   : > { %1080 = dma.done.wait (%p891_p2), %s739_s13, 128  }
 0x470   : > { %1082 = vsyncadd (%p891_p2), %s739_s13, 4294967168  ;;  %p21_p6 = scmp.ge.s32.totalorder %s1197_s15, 4   ;;  %s1390_s24 = smov %s1089_s25 }
 0x471   : > { %s1391_s25 = smov %s1093_s26  ;;  %s1392_s26 = smov %s1209_s18 }
 0x472   : > { %s1393_s27 = smov %s1197_s15  ;;  %23 = sbr.rel (!%p21_p6) target bundleno = 8 (0x8), region = 103 }
 0x477   :  { %745 = vsyncpa [#allocation5], 1 }
 0x478   :  { %747 = vsyncpa [#allocation5 + $0x1], 1 }
 0x479   :  { %748 = vsyncpa [#allocation8], 1 }
 0x47a   :  { %749 = vsyncpa [#allocation6], 1 }
 0x47b   :  { %751 = vsyncpa [#allocation6 + $0x1], 1 }

// kernel: tpu_custom_call.1
= control target key start
LH: loop header
LB: loop body
LE: loop exit
PB: predicated region body
PF: predicated region fallthrough
CT: control target
= control target key end

     0   :  { %s1372_s0 = inlined_call_operand.hbm [shape: bf16[16,32], index: 0, kind: input, shape index: {}]   ;;  %s1373_s1 = inlined_call_operand.vmem [shape: s32[2,1,8], index: 1, kind: input, shape index: {}]   ;;  %s1374_s2 = inlined_call_operand.vmem [shape: s32[2,8,1], index: 2, kind: input, shape index: {}]   ;;  %s1375_s3 = inlined_call_operand.vmem [shape: bf16[32,96], index: 3, kind: input, shape index: {}]   ;;  %s1376_s4 = inlined_call_operand.vmem [shape: f32[1,96], index: 4, kind: input, shape index: {}]   ;;  %s1377_s5 = inlined_call_operand.hbm [shape: bf16[32,32], index: 5, kind: input, shape index: {}]   ;;  %s1378_s6 = inlined_call_operand.vmem [shape: f32[1,32], index: 6, kind: input, shape index: {}]   ;;  %s1379_s7 = inlined_call_operand.hbm [shape: f32[16,32], index: 7, kind: output, shape index: {}]  }
   0x1   :  { %1380 = sst [smem:[#allocation13_spill]] %s1377_s5 }
   0x2   :  { %12 = vsyncpa [#allocation5], 0 }
   0x3   :  { %14 = vsyncpa [#allocation5 + $0x1], 0 }
   0x4   :  { %15 = vsyncpa [#allocation8], 0 }
   0x5   :  { %16 = vsyncpa [#allocation6], 0 }
   0x6   :  { %18 = vsyncpa [#allocation6 + $0x1], 0  ;;  %s1157_s24 = smov 0   ;;  %s1159_s25 = smov 0  }
   0x7   :  { %s1161_s26 = smov 0   ;;  %s1163_s27 = smov 0  }
   0x8 LB: > { %s1381_s5 = sld [smem:[#allocation13_spill]]  ;;  %s1181_s8 = sadd.s32 4294967295, %s1097_s27   ;;  %s1097_s27 = sphi %s1163_s27, %s1393_s27   ;;  %s1093_s26 = sphi %s1161_s26, %s1392_s26   ;;  %s1089_s25 = sphi %s1159_s25, %s1391_s25   ;;  %s1085_s24 = sphi %s1157_s24, %s1390_s24  }
   0x9   : > { %p829_p0 = scmp.ge.s32.totalorder %s1097_s27, 1  ;;  %p45_p1 = scmp.eq.s32.totalorder %s1181_s8, 0 }
   0xa   : > { %p217_p2 = scmp.lt.s32.totalorder %s1097_s27, 3  ;;  %s1099_s10 = smov [#allocation7]  }
   0xb   : > { %s236_s11 = sshll.u32 %s1099_s10, 4  ;;  %s1100_s12 = smov 64   ;;  %s237_s11 = int_to_ptr.vmem [resolvable:$true] %s236_s11 }
   0xc   : > { %p1186_p3 = pnand %p829_p0, %p217_p2  ;;  %s1101_s13 = smov 4  }
   0xd   : > { %s828_s14 = sadd.s32 4294967294, %s1097_s27   ;;  %s1197_s15 = sadd.s32 1, %s1097_s27  }
   0xe   : > { %s234_s30 = sshll.u32 %s1381_s5, 4  ;;  %p881_p4 = pneg %p1186_p3  ;;  %s235_s30 = int_to_ptr.hbm [resolvable:$true] %s234_s30 }
   0xf   : > { %s31_s16 = sadd.s32 1, %s1093_s26  ;;  %s28_s17 = ssub.s32 %s1097_s27, %s1197_s15 }
  0x10   : > { %p882_p6 = pnand %p881_p4, %p45_p1  ;;  %p38_p7 = scmp.ne.s32.totalorder %s1093_s26, %s1089_s25 }
  0x11   : > { %p29_p8 = scmp.eq.s32.totalorder %s28_s17, 0  ;;  %p39_p9 = scmp.eq.s32.totalorder %s1097_s27, 0 }
  0x12   : > { %884 = dma.hbm_to_vmem [thread:$0]  (!%p882_p6), %s235_s30, 256, %s237_s11, [#allocation8], %s1100_s12, %s1100_s12, %s1101_s13  }
  0x13   : > { %p44_p10 = scmp.ne.s32.totalorder %s1089_s25, %s1085_s24  ;;  %p204_p11 = scmp.eq.s32.totalorder %s1181_s8, 1 }
  0x14   : > { %s1209_s18 = scalar_select %p29_p8, %s1093_s26, %s31_s16  }
  0x15   : > { %p1213_p12 = por %p45_p1, %p44_p10  ;;  %p1217_p13 = por %p204_p11, %p38_p7 }
  0x16   : > { %p210_p0 = scmp.eq.s32.totalorder %s828_s14, 1  ;;  %p40_p2 = por %p39_p9, %p38_p7 }
  0x17   : > { %s253_s21 = sand.u32 1, %s1093_s26   ;;  %p894_p6 = scmp.lt.s32.totalorder %s1097_s27, 2 }
  0x18   : > { %p1222_p4 = por %p210_p0, %p44_p10  ;;  %s832_s23 = sshll.u32 %s253_s21, 2 }
  0x19   : > { %s833_s28 = sshll.u32 %s1097_s27, 2  ;;  %s257_s12 = scalar_lea.vmem [#allocation4], %s832_s23 }
  0x1a   : > { %s261_s10 = scalar_lea.hbm %s1372_s0, %s833_s28  ;;  %s265_s13 = sshll.u32 %s257_s12, 4  ;;  %s266_s13 = int_to_ptr.vmem [resolvable:$true] %s265_s13 }
  0x1b   : > { %s263_s11 = sshll.u32 %s261_s10, 4  ;;  %p1231_p8 = pnand %p894_p6, %p40_p2  ;;  %s264_s11 = int_to_ptr.hbm [resolvable:$true] %s263_s11 }
  0x1c   : > { %s254_s16 = scalar_lea.sflag [#allocation5], %s253_s21  ;;  %s997_s17 = sshra.s32 %s264_s11, 4  ;;  %s998_s17 = int_to_ptr.hbm [resolvable:$true] %s997_s17 }
  0x1d   : > { %s999_s5 = scalar_lea.hbm %s998_s17, 4  ;;  %p1001_p9 = pneg %p1231_p8 }
  0x1e   : > { %p1000_p7 = scmp.ne.s32.totalorder %s998_s17, %s999_s5  ;;  %s1004_s23 = scalar_lea.hbm %s1372_s0, 8 }
  0x1f   : > { %p1005_p0 = scmp.lt.s32.totalorder %s998_s17, %s1372_s0  ;;  %p1006_p2 = scmp.lt.s32.totalorder %s1004_s23, %s999_s5 }
  0x20   : > { %p1002_p10 = pnand %p1001_p9, %p1000_p7 }
  0x21   : > { %p1007_p6 = por %p1006_p2, %p1005_p0 }
  0x22   : > { %p1003_p11 = pneg %p1002_p10 }
  0x24   : > { %p1008_p5 = pnand %p1007_p6, %p1003_p11 }
  0x26   : > { %1011 = shalt.err (!%p1008_p5)
}
  0x27   : > { %888 = dma.hbm_to_vmem [thread:$0]  (!%p1231_p8), %s264_s11, 64, %s266_s13, %s254_s16  }
  0x28   : > { %287 = sbr.rel (%p1186_p3) target bundleno = 1129 (0x469), region = 48  ;;  %s1248_s21 = sand.u32 (!%p1186_p3), 1, %s1089_s25  }
  0x29   : > { %s835_s12 = sshll.u32 (!%p1186_p3), %s1248_s21, 2  ;;  %s290_s28 = scalar_lea.sflag (!%p1186_p3), [#allocation5], %s1248_s21 }
  0x2a   : > { %s293_s29 = scalar_lea.vmem (!%p1186_p3), [#allocation4], %s835_s12 }
  0x2d   : > { %1072 = dma.done.wait (%p1213_p12), %s290_s28, 64  }
  0x2e   : > { %1074 = vsyncadd (%p1213_p12), %s290_s28, 4294967232 }
  0x2f   : > { %1076 = dma.done.wait (%p45_p1), [#allocation8], 256  }
  0x30   : > { %1078 = vsyncadd (%p45_p1), [#allocation8], 4294967040  ;;  %v870_v0 = vld [vmem:[%s1375_s3 + $0x8] sm:$0xff]  ;;  %v869_v1 = vld [vmem:[%s1375_s3] sm:$0xff]  ;;  %vm366_vm0 = vcmask 261120   ;;  %vm384_vm1 = vcmask 781312   ;;  %v390_v36 = vlaneseq }
  0x31   : > { %376 = vmatpush.bf16.msra.mxu0 %v870_v0  ;;  %v345_v2 = vld [vmem:[%s293_s29] sm:$0xf]  ;;  %v949_v3 = vld [vmem:[%s1376_s4] ss:$0 sm:$0xff]  ;;  %s1102_s16 = smov 104   ;;  %s1103_s17 = smov 120  }
  0x32   : > { %s1104_s23 = smov 96   ;;  %s1105_s30 = smov 80   ;;  %v1109_v21 = vmov 0   ;;  %vm411_vm2 = vcmask 64512   ;;  %v391_v39 = vshrl.u32 %v390_v36, 7  ;;  %v393_v40 = vand.u32 127, %v390_v36 }
  0x33   : > { %s1106_s10 = smov 72   ;;  %s1107_s12 = smov 88   ;;  %947 = vset.pattern.permute.xlu1 %v1109_v21  ;;  %948 = vset.pattern.permute.xlu0 %v1109_v21  ;;  %vm449_vm10 = vcmask 1043456   ;;  %vm467_vm11 = vcmask 60416   ;;  %vm535_vm12 = vcmask 126016   ;;  %vm603_vm13 = vcmask 191616  }
  0x34   : > { %s1108_s28 = smov 112   ;;  %p337_p1 = scmp.lt.s32.totalorder %s1181_s8, 1  ;;  %vm394_vm7 = vcmp.le.s32.totalorder %v393_v40, %v391_v39  ;;  %vm671_vm14 = vcmask 257216  }
  0x35   : > { %377 = vmatpush.bf16.msra.mxu0 %v869_v1  ;;  %s837_s9 = sshll.u32 %s1248_s21, 3 }
  0x36   : > { %s338_s29 = scalar_select %p337_p1, %s1181_s8, 1 }
  0x38   : > { %847 = vmatmul.msk.bf16.vlgmr.msra.gmra.mxu0 %vm366_vm0, %v345_v2  ;;  %s838_s5 = sshll.u32 %s338_s29, 3 }
  0x39   : > { %s343_s13 = scalar_lea.vmem %s1374_s2, %s838_s5  ;;  %s866_s5 = sshll.u32 %s1181_s8, 3 }
  0x3a   : > { %v386_v22 = vld [vmem:[%s343_s13] sm:$0xff]  ;;  %s722_s19 = scalar_lea.hbm %s1379_s7, %s866_s5  ;;  %s712_s8 = scalar_lea.sflag [#allocation6], %s1248_s21 }
  0x3b   : > { %vm387_vm3 = vcmp.gt.s32.totalorder %v386_v22, 0  ;;  %s1047_s5 = scalar_lea.hbm %s1379_s7, 16 }
  0x3c   : > { %v395_v25 = vsel %vm387_vm3, 1, %v1109_v21 }
  0xb5   : > { %v379_v4 = vpop.f32.mrf.mxu0 }
  0xb6   : > { %v380_v5 = vadd.f32 %v949_v3, %v379_v4 }
  0xb8   : > { %v383_v6 = vpack.c.bf16 %v380_v5, %v380_v5 }
  0xba   : > { %385 = vst.msk [vmem:[#allocation2] sm:$0xf] %vm384_vm1, %v383_v6 }
  0xbd   : > { %v381_v7 = vpop.f32.mrf.mxu0 }
  0xc1   : > { %v605_v8 = vld [vmem:[#allocation2] sm:$0xf] }
  0xc2   : > { %v469_v9 = vld [vmem:[#allocation2] sm:$0xf]  ;;  %v607_v11 = vunpack.c.l.b16 %v605_v8 }
  0xc3   : > { %v405_v10 = vld [vmem:[#allocation2] sm:$0xf]  ;;  %v471_v12 = vunpack.c.l.b16 %v469_v9 }
  0xc4   : > { %v407_v13 = vunpack.c.l.b16 %v405_v10  ;;  %v1270_v14 = vpack.c.b16 %v607_v11, %v607_v11  ;;  %v537_v17 = vld [vmem:[#allocation2] sm:$0xf] }
  0xc5   : > { %v1272_v15 = vpack.c.b16 %v471_v12, %v471_v12  ;;  %v539_v18 = vunpack.c.l.b16 %v537_v17 }
  0xc6   : > { %v1274_v16 = vpack.c.b16 %v407_v13, %v407_v13  ;;  %609 = vrot.lane.b32.xlu2 %v1270_v14, %s1102_s16  ;;  %s339_s16 = scalar_lea.vmem %s1373_s1, %s338_s29  ;;  %s1116_s29 = smov 16  }
  0xc7   : > { %473 = vrot.lane.b32.xlu1 %v1272_v15, %s1103_s17  ;;  %v1279_v19 = vpack.c.b16 %v539_v18, %v539_v18  ;;  %v388_v29 = vld [vmem:[%s339_s16] sm:$0x1]  ;;  %s1110_s17 = smov 64  }
  0xc8   : > { %409 = vrot.lane.b32.xlu0 %v1274_v16, %s1104_s23  ;;  %vm389_vm4 = vcmp.gt.s32.totalorder %v388_v29, 0  ;;  %s1111_s23 = smov 40  }
  0xc9   : > { %v400_v30 = vsel %vm389_vm4, 1, %v1109_v21 }
  0xca   : > { %v401_v37 = vperm.slane %v400_v30, 0 }
  0xcc   : > { %vm402_vm5 = vcmp.eq.s32.totalorder %v401_v37, 1 }
  0xce   : > { %543 = vrot.lane.b32.xlu2 %v1279_v19, %s1105_s30  ;;  %s1112_s30 = smov 56  }
  0xcf   : > { %611 = vrot.lane.b32.xlu1 %v1270_v14, %s1106_s10  ;;  %s1113_s10 = smov 48  }
  0xd0   : > { %475 = vrot.lane.b32.xlu0 %v1272_v15, %s1107_s12  ;;  %s1114_s12 = smov 8  }
  0xd7   : > { %397 = vperm.xlu1 %947, %v395_v25  }
  0xd8   : > { %541 = vrot.lane.b32.xlu0 %v1279_v19, %s1108_s28  ;;  %s1115_s28 = smov 24  }
 0x120   : > { %v610_v20 = vpop.permute.xlu2 %609 }
 0x128   : > { %v544_v23 = vpop.permute.xlu2 %543 }
 0x129   : > { %v549_v24 = vsel %vm411_vm2, %v544_v23, 0 }
 0x12a   : > { %558 = vmatpush.bf16.xpose.msrb.mxu0 %v549_v24 }
 0x139   : > { %v474_v26 = vpop.permute.xlu1 %473 }
 0x13a   : > { %v410_v27 = vpop.permute.xlu0 %409 }
 0x13b   : > { %v416_v28 = vsel %vm411_vm2, %v410_v27, 0 }
 0x13c   : > { %425 = vmatpush.bf16.xpose.msra.mxu1 %v416_v28 }
 0x141   : > { %v612_v31 = vpop.permute.xlu1 %611 }
 0x142   : > { %v476_v32 = vpop.permute.xlu0 %475  ;;  %v617_v33 = vsel %vm411_vm2, %v612_v31, 0 }
 0x143   : > { %848 = vmatmul.msk.bf16.vlgmr.msra.gmra.mxu1 %vm411_vm2, %v405_v10  ;;  %v481_v34 = vsel %vm411_vm2, %v476_v32, 0 }
 0x144   : > { %490 = vmatpush.bf16.xpose.msra.mxu3 %v481_v34 }
 0x149   : > { %v398_v38 = vpop.permute.xlu1 %397 }
 0x14a   : > { %v542_v35 = vpop.permute.xlu0 %541  ;;  %vm399_vm6 = vcmp.eq.s32.totalorder %v398_v38, 1 }
 0x14b   : > { %850 = vmatmul.msk.bf16.vlgmr.msra.gmra.mxu3 %vm411_vm2, %v474_v26  ;;  %852 = vmatmul.msk.bf16.vlgmr.msrb.gmra.mxu0 %vm411_vm2, %v542_v35  ;;  %vm403_vm8 = vmand %vm399_vm6, %vm402_vm5 }
 0x14c   : > { %626 = vmatpush.bf16.xpose.msrb.mxu3 %v617_v33  ;;  %vm1301_vm9 = vmand %vm403_vm8, %vm394_vm7 }
 0x15b   : > { %854 = vmatmul.msk.bf16.vlgmr.msrb.gmra.mxu3 %vm411_vm2, %v610_v20 }
 0x1c0   : > { %v427_v42 = vpop.f32.mrf.mxu1 }
 0x1c1   : > { %v431_v43 = vsel %vm1301_vm9, %v427_v42, -1e+09 }
 0x1c2   : > { %v432_v44 = vsel %vm411_vm2, %v431_v43, -inf }
 0x1c3   : > { %433 = vmax.xlane.f32.xlu2 %v432_v44 }
 0x1c8   : > { %v429_v45 = vpop.f32.mrf.mxu1  ;;  %v560_v46 = vpop.f32.mrf.mxu0 }
 0x1c9   : > { %v564_v47 = vsel %vm1301_vm9, %v560_v46, -1e+09 }
 0x1ca   : > { %v565_v48 = vsel %vm411_vm2, %v564_v47, -inf }
 0x1cb   : > { %566 = vmax.xlane.f32.xlu2 %v565_v48 }
 0x1ce   : > { %v492_v49 = vpop.f32.mrf.mxu3 }
 0x1cf   : > { %v496_v50 = vsel %vm1301_vm9, %v492_v49, -1e+09 }
 0x1d0   : > { %v562_v51 = vpop.f32.mrf.mxu0  ;;  %v497_v52 = vsel %vm411_vm2, %v496_v50, -inf }
 0x1d1   : > { %498 = vmax.xlane.f32.xlu0 %v497_v52  ;;  %v871_v51 = vld [vmem:[#allocation7] sm:$0xff] }
 0x1d6   : > { %v494_v53 = vpop.f32.mrf.mxu3 }
 0x1de   : > { %v628_v54 = vpop.f32.mrf.mxu3 }
 0x1df   : > { %v632_v55 = vsel %vm1301_vm9, %v628_v54, -1e+09 }
 0x1e0   : > { %v633_v56 = vsel %vm411_vm2, %v632_v55, -inf }
 0x1e1   : > { %634 = vmax.xlane.f32.xlu1 %v633_v56  ;;  %v950_v56 = vld [vmem:[%s1378_s6] ss:$0 sm:$0xff] }
 0x1e5   : > { %444 = vrot.lane.b32.xlu0 %v1274_v16, %s1110_s17  ;;  %s336_s17 = scalar_lea.vmem [#allocation9], %s837_s9 }
 0x1e6   : > { %v630_v57 = vpop.f32.mrf.mxu3 }
 0x1ed   : > { %645 = vrot.lane.b32.xlu0 %v1270_v14, %s1111_s23  ;;  %s724_s23 = sshll.u32 %s336_s17, 4  ;;  %s725_s23 = int_to_ptr.vmem [resolvable:$true] %s724_s23 }
 0x236   : > { %v434_v58 = vpop.xlane.xlu2 %433 }
 0x237   : > { %v435_v59 = vsub.f32 %v431_v43, %v434_v58 }
 0x239   : > { %v436_v60 = vmul.f32 1.442695, %v435_v59 }
 0x23b   : > { %951 = vpow2.f32 %v436_v60 }
 0x23e   : > { %v567_v61 = vpop.xlane.xlu2 %566 }
 0x23f   : > { %v568_v62 = vsub.f32 %v564_v47, %v567_v61 }
 0x241   : > { %v952_v63 = vpop.eup %951  ;;  %v569_v0 = vmul.f32 1.442695, %v568_v62 }
 0x242   : > { %v438_v1 = vsel %vm411_vm2, %v952_v63, 0.0 }
 0x243   : > { %953 = vpow2.f32 %v569_v0  ;;  %439 = vadd.xlane.f32.xlu2 %v438_v1 }
 0x244   : > { %v499_v2 = vpop.xlane.xlu0 %498 }
 0x245   : > { %v500_v3 = vsub.f32 %v496_v50, %v499_v2  ;;  %v872_v50 = vld [vmem:[#allocation7 + $0x8] sm:$0xff] }
 0x246   : > { %703 = vmatpush.bf16.msra.mxu0 %v872_v50 }
 0x247   : > { %v501_v4 = vmul.f32 1.442695, %v500_v3 }
 0x249   : > { %v954_v5 = vpop.eup %953  ;;  %955 = vpow2.f32 %v501_v4 }
 0x24a   : > { %v571_v6 = vsel %vm411_vm2, %v954_v5, 0.0  ;;  %704 = vmatpush.bf16.msra.mxu0 %v871_v51 }
 0x24b   : > { %572 = vadd.xlane.f32.xlu1 %v571_v6 }
 0x24f   : > { %v956_v7 = vpop.eup %955 }
 0x250   : > { %v503_v8 = vsel %vm411_vm2, %v956_v7, 0.0 }
 0x253   : > { %504 = vadd.xlane.f32.xlu1 %v503_v8 }
 0x254   : > { %v635_v9 = vpop.xlane.xlu1 %634 }
 0x255   : > { %v636_v10 = vsub.f32 %v632_v55, %v635_v9 }
 0x257   : > { %v637_v11 = vmul.f32 1.442695, %v636_v10  ;;  %v445_v12 = vpop.permute.xlu0 %444 }
 0x258   : > { %v451_v13 = vsel %vm449_vm10, %v445_v12, 0 }
 0x259   : > { %957 = vpow2.f32 %v637_v11  ;;  %460 = vmatpush.bf16.msra.mxu2 %v451_v13 }
 0x25b   : > { %509 = vrot.lane.b32.xlu2 %v1272_v15, %s1112_s30  ;;  %s726_s30 = sshll.u32 %s722_s19, 4  ;;  %s727_s30 = int_to_ptr.hbm [resolvable:$true] %s726_s30 }
 0x25f   : > { %v958_v14 = vpop.eup %957  ;;  %v646_v23 = vpop.permute.xlu0 %645 }
 0x260   : > { %v639_v16 = vsel %vm411_vm2, %v958_v14, 0.0  ;;  %v651_v15 = vsel %vm449_vm10, %v646_v23, 0 }
 0x261   : > { %640 = vadd.xlane.f32.xlu1 %v639_v16 }
 0x27a   : > { %577 = vrot.lane.b32.xlu1 %v1279_v19, %s1113_s10  ;;  %s1041_s10 = sshra.s32 %s727_s30, 4  ;;  %s1042_s10 = int_to_ptr.hbm [resolvable:$true] %s1041_s10 }
 0x27b   : > { %p1048_p8 = scmp.lt.s32.totalorder %s1042_s10, %s1379_s7 }
 0x2b6   : > { %v440_v17 = vpop.xlane.xlu2 %439 }
 0x2b7   : > { %959 = vrcp.f32 %v440_v17 }
 0x2bd   : > { %v960_v18 = vpop.eup %959 }
 0x2be   : > { %v573_v20 = vpop.xlane.xlu1 %572  ;;  %v510_v21 = vpop.permute.xlu2 %509  ;;  %v442_v22 = vmul.f32 %v960_v18, %v952_v63 }
 0x2bf   : > { %v515_v24 = vsel %vm449_vm10, %v510_v21, 0 }
 0x2c0   : > { %524 = vmatpush.bf16.msrb.mxu2 %v515_v24  ;;  %v443_v25 = vpack.c.bf16 %v442_v22, %v442_v22 }
 0x2c2   : > { %849 = vmatmul.msk.bf16.vlgmr.msra.gmra.mxu2 %vm411_vm2, %v443_v25 }
 0x2c4   : > { %660 = vmatpush.bf16.msra.mxu2 %v651_v15 }
 0x2c6   : > { %v505_v26 = vpop.xlane.xlu1 %504 }
 0x2c7   : > { %961 = vrcp.f32 %v505_v26 }
 0x2cd   : > { %v962_v27 = vpop.eup %961 }
 0x2ce   : > { %v507_v19 = vmul.f32 %v962_v27, %v956_v7 }
 0x2d0   : > { %v508_v28 = vpack.c.bf16 %v507_v19, %v507_v19 }
 0x2d2   : > { %851 = vmatmul.msk.bf16.vlgmr.msrb.gmra.mxu2 %vm411_vm2, %v508_v28 }
 0x2d4   : > { %v641_v29 = vpop.xlane.xlu1 %640 }
 0x2d5   : > { %963 = vrcp.f32 %v641_v29 }
 0x2d6   : > { %965 = vrcp.f32 %v573_v20 }
 0x2db   : > { %v964_v30 = vpop.eup %963 }
 0x2dc   : > { %v643_v31 = vmul.f32 %v964_v30, %v958_v14  ;;  %v966_v33 = vpop.eup %965 }
 0x2dd   : > { %v575_v34 = vmul.f32 %v966_v33, %v954_v5 }
 0x2de   : > { %v644_v32 = vpack.c.bf16 %v643_v31, %v643_v31 }
 0x2df   : > { %v576_v37 = vpack.c.bf16 %v575_v34, %v575_v34 }
 0x2e2   : > { %855 = vmatmul.msk.bf16.vlgmr.msra.gmra.mxu2 %vm411_vm2, %v644_v32 }
 0x2ec   : > { %v578_v35 = vpop.permute.xlu1 %577 }
 0x2ed   : > { %v583_v36 = vsel %vm449_vm10, %v578_v35, 0 }
 0x2ee   : > { %592 = vmatpush.bf16.msrb.mxu1 %v583_v36 }
 0x2f1   : > { %853 = vmatmul.msk.bf16.vlgmr.msrb.gmra.mxu1 %vm411_vm2, %v576_v37 }
 0x345   : > { %v462_v38 = vpop.f32.mrf.mxu2 }
 0x346   : > { %v466_v39 = vpack.c.bf16 %v462_v38, %v462_v38 }
 0x348   : > { %468 = vst.msk [vmem:[#allocation3] sm:$0xf] %vm467_vm11, %v466_v39 }
 0x34d   : > { %v464_v40 = vpop.f32.mrf.mxu2 }
 0x355   : > { %v526_v41 = vpop.f32.mrf.mxu2 }
 0x356   : > { %v530_v42 = vpack.c.bf16 %v526_v41, %v526_v41 }
 0x358   : > { %532 = vrot.lane.b32.xlu0 %v530_v42, %s1114_s12  ;;  %s1043_s12 = scalar_lea.hbm %s1042_s10, 8 }
 0x359   : > { %p1044_p3 = scmp.ne.s32.totalorder %s1042_s10, %s1043_s12  ;;  %p1049_p7 = scmp.lt.s32.totalorder %s1047_s5, %s1043_s12 }
 0x35b   : > { %p1045_p5 = pnand %p1044_p3, %p1217_p13  ;;  %p1050_p9 = por %p1049_p7, %p1048_p8 }
 0x35d   : > { %v528_v43 = vpop.f32.mrf.mxu2  ;;  %p1046_p12 = pneg %p1045_p5 }
 0x35f   : > { %p1051_p10 = pnand %p1050_p9, %p1046_p12 }
 0x365   : > { %v662_v44 = vpop.f32.mrf.mxu2 }
 0x366   : > { %v666_v45 = vpack.c.bf16 %v662_v44, %v662_v44 }
 0x368   : > { %668 = vrot.lane.b32.xlu0 %v666_v45, %s1115_s28 }
 0x36d   : > { %v664_v46 = vpop.f32.mrf.mxu2 }
 0x36e   : > { %v594_v47 = vpop.f32.mrf.mxu1 }
 0x36f   : > { %v598_v48 = vpack.c.bf16 %v594_v47, %v594_v47 }
 0x371   : > { %600 = vrot.lane.b32.xlu2 %v598_v48, %s1116_s29 }
 0x376   : > { %v596_v49 = vpop.f32.mrf.mxu1 }
 0x3ca   : > { %v533_v52 = vpop.permute.xlu0 %532 }
 0x3cb   : > { %536 = vst.msk [vmem:[#allocation3] sm:$0xf] %vm535_vm12, %v533_v52  ;;  %v601_v53 = vpop.permute.xlu2 %600 }
 0x3cc   : > { %604 = vst.msk [vmem:[#allocation3] sm:$0xf] %vm603_vm13, %v601_v53 }
 0x3da   : > { %v669_v54 = vpop.permute.xlu0 %668 }
 0x3db   : > { %672 = vst.msk [vmem:[#allocation3] sm:$0xf] %vm671_vm14, %v669_v54 }
 0x3e2   : > { %v673_v55 = vld [vmem:[#allocation3] sm:$0xf] }
 0x3e3   : > { %864 = vmatmul.msk.bf16.vlgmr.msra.gmra.mxu0 %vm366_vm0, %v673_v55 }
 0x460   : > { %v706_v57 = vpop.f32.mrf.mxu0 }
 0x461   : > { %v707_v58 = vadd.f32 %v950_v56, %v706_v57 }
 0x463   : > { %710 = vst.msk [vmem:[%s336_s17] sm:$0xff] %vm366_vm0, %v707_v58 }
 0x464   : > { %1054 = shalt.err (!%p1051_p10)
}
 0x465   : > { %879 = dma.vmem_to_hbm [thread:$0]  (%p1217_p13), %s725_s23, 128, %s727_s30, %s712_s8  }
 0x468   : > { %v708_v59 = vpop.f32.mrf.mxu0 }
 0x469 PF: > { %s738_s21 = sand.u32 1, %s1085_s24   ;;  %p1389_p11 = scmp.ge.s32.totalorder %s1097_s27, 2 }
 0x46a   : > { %s739_s13 = scalar_lea.sflag [#allocation6], %s738_s21 }
 0x46b   : > { %p890_p0 = pnand %p1389_p11, %p1222_p4 }
 0x46d   : > { %p891_p2 = pneg %p890_p0 }
 0x46f   : > { %1080 = dma.done.wait (%p891_p2), %s739_s13, 128  }
 0x470   : > { %1082 = vsyncadd (%p891_p2), %s739_s13, 4294967168  ;;  %p21_p6 = scmp.ge.s32.totalorder %s1197_s15, 4   ;;  %s1390_s24 = smov %s1089_s25 }
 0x471   : > { %s1391_s25 = smov %s1093_s26  ;;  %s1392_s26 = smov %s1209_s18 }
 0x472   : > { %s1393_s27 = smov %s1197_s15  ;;  %23 = sbr.rel (!%p21_p6) target bundleno = 8 (0x8), region = 103 }
 0x477   :  { %745 = vsyncpa [#allocation5], 1 }
 0x478   :  { %747 = vsyncpa [#allocation5 + $0x1], 1 }
 0x479   :  { %748 = vsyncpa [#allocation8], 1 }
 0x47a   :  { %749 = vsyncpa [#allocation6], 1 }
 0x47b   :  { %751 = vsyncpa [#allocation6 + $0x1], 1 }

</bundles_post_ra>
